<compile_context>
chip_gen: v6e
topology: v6e:2x2x1
jax: 0.10.0
libtpu: 0.0.40
codegen_flags: <defaults>
</compile_context>

<pallas_src>
import functools
import math

import jax
import jax.numpy as jnp
from jax.experimental import pallas as pl
from jax.experimental.pallas import tpu as pltpu


# --------------------------------------------------------------------------
# Pallas kernel: one timestep per grid iteration, state carried in VMEM.
# --------------------------------------------------------------------------
def _hyper_rhn_seq_kernel(
    x_ref,                      # (1, B, E)        timestep t input
    sh0_ref, sn0_ref,           # (B, hH), (B, hN) initial states (t == 0)
    w_ih_hh_ref, w_ih_tt_ref,   # (E, hH)          hyper inp weights (hh / tt)
    b_ih_hh_ref, b_ih_tt_ref,   # (1, hH)
    w_ch_hh_ref, w_ch_tt_ref,   # (depth, hH, hH)  hyper cell weights
    b_ch_hh_ref, b_ch_tt_ref,   # (depth, 1, hH)
    w_p_ref, b_p_ref,           # (depth, hH, hN), (depth, 1, hN)  upscaleProj
    w_in_hh_ref, w_in_tt_ref,   # (E, hN)          network inp weights
    b_in_hh_ref, b_in_tt_ref,   # (1, hN)
    w_cn_hh_ref, w_cn_tt_ref,   # (depth, hN, hN)  network cell weights
    b_cn_hh_ref, b_cn_tt_ref,   # (depth, 1, hN)
    sh_out_ref,                 # (1, B, depth*hH) packed per-layer hyper states
    sn_out_ref,                 # (1, B, depth*hN) packed per-layer net states
    sh_st, sn_st,               # VMEM scratch: carried recurrent state (f32)
    *, state_provided: bool,
):
    f32 = jnp.float32
    depth = w_ch_hh_ref.shape[0]
    cd = w_ih_hh_ref.dtype                    # MXU operand dtype (f32 or bf16)

    first = pl.program_id(0) == 0

    @pl.when(first)
    def _():                                  # load / zero carried state once
        sh_st[...] = sh0_ref[...]
        sn_st[...] = sn0_ref[...]

    x = x_ref[0].astype(cd)                   # (B, E)
    s_h = sh_st[...]                          # (B, hH) f32
    s_n = sn_st[...]                          # (B, hN) f32

    # Layer-0 cell bias only exists when the incoming state is a tensor
    # (explicit s0 at t==0, or the state carried from a previous timestep).
    if state_provided:
        cb = f32(1.0)
    else:
        cb = jnp.where(first, f32(0.0), f32(1.0))

    def mm(a, w):                             # MXU dot, f32 accumulation
        return jnp.dot(a.astype(cd), w, preferred_element_type=f32)

    # ---------------- hyper chain (plain RHN), all depth layers ----------
    hyper_states = []
    for l in range(depth):
        if l == 0:
            hh_pre = (mm(x, w_ih_hh_ref[...]) + b_ih_hh_ref[...]
                      + mm(s_h, w_ch_hh_ref[0]) + cb * b_ch_hh_ref[0])
            tt_pre = (mm(x, w_ih_tt_ref[...]) + b_ih_tt_ref[...]
                      + mm(s_h, w_ch_tt_ref[0]) + cb * b_ch_tt_ref[0])
        else:
            hh_pre = mm(s_h, w_ch_hh_ref[l]) + b_ch_hh_ref[l]
            tt_pre = mm(s_h, w_ch_tt_ref[l]) + b_ch_tt_ref[l]
        tt = jax.nn.sigmoid(tt_pre)
        s_h = jnp.tanh(hh_pre) * tt + s_h * (1.0 - tt)
        hyper_states.append(s_h)

    # ---------------- upscale projections z[l] ---------------------------
    zs = [mm(hyper_states[l], w_p_ref[l]) + b_p_ref[l] for l in range(depth)]

    # ---------------- network chain (hyper-modulated RHN) ----------------
    net_states = []
    for l in range(depth):
        z = zs[l]
        if l == 0:
            hh_pre = (mm(x, w_in_hh_ref[...]) * z + b_in_hh_ref[...]
                      + cb * (mm(s_n, w_cn_hh_ref[0]) * z)
                      + cb * b_cn_hh_ref[0])
            tt_pre = (mm(x, w_in_tt_ref[...]) * z + b_in_tt_ref[...]
                      + cb * (mm(s_n, w_cn_tt_ref[0]) * z)
                      + cb * b_cn_tt_ref[0])
        else:
            hh_pre = mm(s_n, w_cn_hh_ref[l]) * z + b_cn_hh_ref[l]
            tt_pre = mm(s_n, w_cn_tt_ref[l]) * z + b_cn_tt_ref[l]
        tt = jax.nn.sigmoid(tt_pre)
        s_n = jnp.tanh(hh_pre) * tt + s_n * (1.0 - tt)
        net_states.append(s_n)

    # carry the recurrent state to the next timestep
    sh_st[...] = s_h
    sn_st[...] = s_n

    # lane-packed all-depth outputs for this timestep
    sh_out_ref[0] = jnp.concatenate(hyper_states, axis=1)
    sn_out_ref[0] = jnp.concatenate(net_states, axis=1)


# --------------------------------------------------------------------------
# Wrappers
# --------------------------------------------------------------------------
def _resident_spec(shape):
    rank = len(shape)
    return pl.BlockSpec(shape, lambda *_: (0,) * rank)


@functools.partial(jax.jit, static_argnames=("matmul_dtype",))
def hyper_rhn_sequence(xs, params, s0=None, matmul_dtype=jnp.float32):
    """Run the HyperRHNCell recurrence over a whole sequence in ONE pallas_call.

    xs: (T, B, E).  Step t uses (sHyper[t-1][-1], sNetwork[t-1][-1]) as its
    incoming state (or s0 / the module's `0` initialisation at t == 0).
    Returns (sHyper_all, sNetwork_all) with shapes (T, depth, B, hHyper) and
    (T, depth, B, hNetwork).
    """
    (w_inp_h, b_inp_h, w_cell_h, b_cell_h,
     w_proj, b_proj, w_inp_n, b_inp_n, w_cell_n, b_cell_n) = params

    T, B, E = xs.shape
    depth, hH = w_cell_h.shape[0], w_cell_h.shape[1]
    hN = w_proj.shape[2]
    md = jnp.dtype(matmul_dtype)

    # Split fused (..., 2h) gate weights into separate hh / tt tensors so the
    # kernel does whole-tile gate math (no intra-vreg slicing, no cat(z, z)).
    # Only matmul operands take the MXU dtype; biases & gate math stay f32.
    def split2(a, h):
        return a[..., :h], a[..., h:]

    w_ih_hh, w_ih_tt = split2(w_inp_h, hH)
    b_ih_hh, b_ih_tt = split2(b_inp_h, hH)
    w_ch_hh, w_ch_tt = split2(w_cell_h, hH)
    b_ch_hh, b_ch_tt = split2(b_cell_h, hH)
    w_in_hh, w_in_tt = split2(w_inp_n, hN)
    b_in_hh, b_in_tt = split2(b_inp_n, hN)
    w_cn_hh, w_cn_tt = split2(w_cell_n, hN)
    b_cn_hh, b_cn_tt = split2(b_cell_n, hN)

    weights = (
        w_ih_hh.astype(md), w_ih_tt.astype(md), b_ih_hh, b_ih_tt,
        w_ch_hh.astype(md), w_ch_tt.astype(md), b_ch_hh, b_ch_tt,
        w_proj.astype(md), b_proj,
        w_in_hh.astype(md), w_in_tt.astype(md), b_in_hh, b_in_tt,
        w_cn_hh.astype(md), w_cn_tt.astype(md), b_cn_hh, b_cn_tt,
    )

    state_provided = s0 is not None
    if state_provided:
        sh0 = s0[0].astype(jnp.float32)
        sn0 = s0[1].astype(jnp.float32)
    else:
        sh0 = jnp.zeros((B, hH), jnp.float32)
        sn0 = jnp.zeros((B, hN), jnp.float32)

    kernel = functools.partial(_hyper_rhn_seq_kernel,
                               state_provided=state_provided)

    in_specs = ([pl.BlockSpec((1, B, E), lambda t: (t, 0, 0)),
                 _resident_spec((B, hH)), _resident_spec((B, hN))]
                + [_resident_spec(w.shape) for w in weights])
    out_specs = (pl.BlockSpec((1, B, depth * hH), lambda t: (t, 0, 0)),
                 pl.BlockSpec((1, B, depth * hN), lambda t: (t, 0, 0)))
    out_shape = (jax.ShapeDtypeStruct((T, B, depth * hH), jnp.float32),
                 jax.ShapeDtypeStruct((T, B, depth * hN), jnp.float32))

    sh_packed, sn_packed = pl.pallas_call(
        kernel,
        out_shape=out_shape,
        grid_spec=pltpu.PrefetchScalarGridSpec(
            num_scalar_prefetch=0,
            grid=(T,),
            in_specs=in_specs,
            out_specs=out_specs,
            scratch_shapes=[pltpu.VMEM((B, hH), jnp.float32),
                            pltpu.VMEM((B, hN), jnp.float32)]),
        compiler_params=pltpu.CompilerParams(
            dimension_semantics=("arbitrary",)),   # recurrence over time
    )(xs.astype(md), sh0, sn0, *weights)

    sh_all = sh_packed.reshape(T, B, depth, hH).transpose(0, 2, 1, 3)
    sn_all = sn_packed.reshape(T, B, depth, hN).transpose(0, 2, 1, 3)
    return sh_all, sn_all


def hyper_rhn_cell(x, params, s=None, matmul_dtype=jnp.float32):
    """Exact HyperRHNCell.forward (eval mode) for one timestep.

    Returns (out, (sHyper[-1], sNetwork[-1]), (sHyper_all, sNetwork_all)).
    """
    sh_all, sn_all = hyper_rhn_sequence(x[None], params, s0=s,
                                        matmul_dtype=matmul_dtype)
    sh_all, sn_all = sh_all[0], sn_all[0]          # (depth, B, h)
    out = sn_all[-1]
    return out, (sh_all[-1], sn_all[-1]), (sh_all, sn_all)


# --------------------------------------------------------------------------
# Deterministic parameter init (uniform(-1/sqrt(fan_in), 1/sqrt(fan_in)),
# mirroring the PyTorch reset_parameters / default Linear init shapes).
# Weights are stored pre-transposed as (in, out); gate layout is [hh | tt].
# --------------------------------------------------------------------------
def init_params(key, embed_dim, h_hyper, h_network, depth):
    keys = jax.random.split(key, 5)

    def lin(k, fan_in, fan_out):
        kw, kb = jax.random.split(k)
        stdv = 1.0 / math.sqrt(fan_in)
        w = jax.random.uniform(kw, (fan_in, fan_out), jnp.float32, -stdv, stdv)
        b = jax.random.uniform(kb, (1, fan_out), jnp.float32, -stdv, stdv)
        return w, b

    def lin_stack(k, n, fan_in, fan_out):
        ws, bs = [], []
        for kk in jax.random.split(k, n):
            w, b = lin(kk, fan_in, fan_out)
            ws.append(w)
            bs.append(b)
        return jnp.stack(ws), jnp.stack(bs)

    w_inp_h, b_inp_h = lin(keys[0], embed_dim, 2 * h_hyper)
    w_cell_h, b_cell_h = lin_stack(keys[1], depth, h_hyper, 2 * h_hyper)
    w_proj, b_proj = lin_stack(keys[2], depth, h_hyper, h_network)
    w_inp_n, b_inp_n = lin(keys[3], embed_dim, 2 * h_network)
    w_cell_n, b_cell_n = lin_stack(keys[4], depth, h_network, 2 * h_network)

    return (w_inp_h, b_inp_h, w_cell_h, b_cell_h,
            w_proj, b_proj, w_inp_n, b_inp_n, w_cell_n, b_cell_n)


# --------------------------------------------------------------------------
# Pure-JAX reference (mirrors the PyTorch module, eval mode)
# --------------------------------------------------------------------------
def reference_cell(x, params, s=None):
    (w_inp_h, b_inp_h, w_cell_h, b_cell_h,
     w_proj, b_proj, w_inp_n, b_inp_n, w_cell_n, b_cell_n) = params
    depth, hH = w_cell_h.shape[0], w_cell_h.shape[1]
    hN = w_cell_n.shape[1]

    def gate(ws, s_prev, h):
        hh = jnp.tanh(ws[:, :h])
        tt = jax.nn.sigmoid(ws[:, h:])
        return hh * tt + s_prev * (1.0 - tt)

    # hyper RHN
    s_h = jnp.zeros((x.shape[0], hH), jnp.float32) if s is None else s[0]
    s_hyper = []
    for l in range(depth):
        if l == 0:
            ws = x @ w_inp_h + b_inp_h
            if s is not None:                       # tensor state: cell branch too
                ws = ws + s_h @ w_cell_h[0] + b_cell_h[0]
        else:
            ws = s_h @ w_cell_h[l] + b_cell_h[l]
        s_h = gate(ws, s_h, hH)
        s_hyper.append(s_h)

    z = [s_hyper[l] @ w_proj[l] + b_proj[l] for l in range(depth)]

    # network HyperCell
    s_n = jnp.zeros((x.shape[0], hN), jnp.float32) if s is None else s[1]
    s_net = []
    for l in range(depth):
        zz = jnp.concatenate([z[l], z[l]], axis=1)
        if l == 0:
            ws = (x @ w_inp_n) * zz + b_inp_n
            if s is not None:
                ws = ws + (s_n @ w_cell_n[0]) * zz + b_cell_n[0]
        else:
            ws = (s_n @ w_cell_n[l]) * zz + b_cell_n[l]
        s_n = gate(ws, s_n, hN)
        s_net.append(s_n)

    return s_n, (s_hyper[-1], s_net[-1]), (jnp.stack(s_hyper), jnp.stack(s_net))


def reference_sequence(xs, params):
    s = None
    sh_all, sn_all = [], []
    for t in range(xs.shape[0]):
        _, s, (sh, sn) = reference_cell(xs[t], params, s=s)
        sh_all.append(sh)
        sn_all.append(sn)
    return jnp.stack(sh_all), jnp.stack(sn_all)


# --------------------------------------------------------------------------
if __name__ == "__main__":
    B, E, hH, hN, depth, T = 8, 32, 16, 32, 3, 8

    key = jax.random.PRNGKey(0)
    kx, ks, kh, kn, kp = jax.random.split(key, 5)
    x = jax.random.normal(kx, (B, E), jnp.float32)
    xs = jax.random.normal(ks, (T, B, E), jnp.float32)
    params = init_params(kp, E, hH, hN, depth)

    # 1) single step, zero (module-default) initial state
    out, (sh, sn), (sh_all, sn_all) = hyper_rhn_cell(x, params)
    jax.block_until_ready(out)
    r_out, _, (r_sh_all, r_sn_all) = reference_cell(x, params)
    assert jnp.allclose(out, r_out, atol=1e-5, rtol=1e-5)
    assert jnp.allclose(sh_all, r_sh_all, atol=1e-5, rtol=1e-5)
    assert jnp.allclose(sn_all, r_sn_all, atol=1e-5, rtol=1e-5)

    # 2) single step with an explicitly provided state tensor
    s0 = (0.5 * jax.random.normal(kh, (B, hH), jnp.float32),
          0.5 * jax.random.normal(kn, (B, hN), jnp.float32))
    out2, _, (sh_all2, sn_all2) = hyper_rhn_cell(x, params, s=s0)
    r_out2, _, (r_sh_all2, r_sn_all2) = reference_cell(x, params, s=s0)
    assert jnp.allclose(out2, r_out2, atol=1e-5, rtol=1e-5)
    assert jnp.allclose(sh_all2, r_sh_all2, atol=1e-5, rtol=1e-5)
    assert jnp.allclose(sn_all2, r_sn_all2, atol=1e-5, rtol=1e-5)

    # 3) whole T-step recurrence fused into ONE pallas_call
    sh_seq, sn_seq = hyper_rhn_sequence(xs, params)
    jax.block_until_ready((sh_seq, sn_seq))
    r_sh_seq, r_sn_seq = reference_sequence(xs, params)
    assert jnp.allclose(sh_seq, r_sh_seq, atol=1e-4, rtol=1e-4)
    assert jnp.allclose(sn_seq, r_sn_seq, atol=1e-4, rtol=1e-4)

    # 4) bf16 MXU-operand path (v6e/v7x friendly); f32 accumulation + gate math
    sh_bf, sn_bf = hyper_rhn_sequence(xs, params, matmul_dtype=jnp.bfloat16)
    jax.block_until_ready((sh_bf, sn_bf))
    assert float(jnp.max(jnp.abs(sh_bf - r_sh_seq))) < 1e-1
    assert float(jnp.max(jnp.abs(sn_bf - r_sn_seq))) < 1e-1

    print("KERNEL_OK")
</pallas_src>

<mosaic_0001>
module attributes {stable_mosaic.version = 11 : i64} {
  func.func @_hyper_rhn_seq_kernel(%arg0: i32, %arg1: memref<1x8x32xf32, #tpu.memory_space<vmem>>, %arg2: memref<8x16xf32, #tpu.memory_space<vmem>>, %arg3: memref<8x32xf32, #tpu.memory_space<vmem>>, %arg4: memref<32x16xf32, #tpu.memory_space<vmem>>, %arg5: memref<32x16xf32, #tpu.memory_space<vmem>>, %arg6: memref<1x16xf32, #tpu.memory_space<vmem>>, %arg7: memref<1x16xf32, #tpu.memory_space<vmem>>, %arg8: memref<3x16x16xf32, #tpu.memory_space<vmem>>, %arg9: memref<3x16x16xf32, #tpu.memory_space<vmem>>, %arg10: memref<3x1x16xf32, #tpu.memory_space<vmem>>, %arg11: memref<3x1x16xf32, #tpu.memory_space<vmem>>, %arg12: memref<3x16x32xf32, #tpu.memory_space<vmem>>, %arg13: memref<3x1x32xf32, #tpu.memory_space<vmem>>, %arg14: memref<32x32xf32, #tpu.memory_space<vmem>>, %arg15: memref<32x32xf32, #tpu.memory_space<vmem>>, %arg16: memref<1x32xf32, #tpu.memory_space<vmem>>, %arg17: memref<1x32xf32, #tpu.memory_space<vmem>>, %arg18: memref<3x32x32xf32, #tpu.memory_space<vmem>>, %arg19: memref<3x32x32xf32, #tpu.memory_space<vmem>>, %arg20: memref<3x1x32xf32, #tpu.memory_space<vmem>>, %arg21: memref<3x1x32xf32, #tpu.memory_space<vmem>>, %arg22: memref<1x8x48xf32, #tpu.memory_space<vmem>>, %arg23: memref<1x8x96xf32, #tpu.memory_space<vmem>>, %arg24: memref<8x16xf32, #tpu.memory_space<vmem>>, %arg25: memref<8x32xf32, #tpu.memory_space<vmem>>) attributes {dimension_semantics = [#tpu.dimension_semantics<arbitrary>], iteration_bounds = array<i64: 1>, scalar_prefetch = 0 : i64, scratch_operands = 2 : i64, tpu.core_type = #tpu.core_type<tc>, window_params = [{transform_indices = @transform_0, window_bounds = array<i64: 1, 8, 32>}, {pipeline_mode = #tpu.pipeline_mode<synchronous>, transform_indices = @transform_1, window_bounds = array<i64: 8, 16>}, {pipeline_mode = #tpu.pipeline_mode<synchronous>, transform_indices = @transform_2, window_bounds = array<i64: 8, 32>}, {pipeline_mode = #tpu.pipeline_mode<synchronous>, transform_indices = @transform_3, window_bounds = array<i64: 32, 16>}, {pipeline_mode = #tpu.pipeline_mode<synchronous>, transform_indices = @transform_4, window_bounds = array<i64: 32, 16>}, {pipeline_mode = #tpu.pipeline_mode<synchronous>, transform_indices = @transform_5, window_bounds = array<i64: 1, 16>}, {pipeline_mode = #tpu.pipeline_mode<synchronous>, transform_indices = @transform_6, window_bounds = array<i64: 1, 16>}, {pipeline_mode = #tpu.pipeline_mode<synchronous>, transform_indices = @transform_7, window_bounds = array<i64: 3, 16, 16>}, {pipeline_mode = #tpu.pipeline_mode<synchronous>, transform_indices = @transform_8, window_bounds = array<i64: 3, 16, 16>}, {pipeline_mode = #tpu.pipeline_mode<synchronous>, transform_indices = @transform_9, window_bounds = array<i64: 3, 1, 16>}, {pipeline_mode = #tpu.pipeline_mode<synchronous>, transform_indices = @transform_10, window_bounds = array<i64: 3, 1, 16>}, {pipeline_mode = #tpu.pipeline_mode<synchronous>, transform_indices = @transform_11, window_bounds = array<i64: 3, 16, 32>}, {pipeline_mode = #tpu.pipeline_mode<synchronous>, transform_indices = @transform_12, window_bounds = array<i64: 3, 1, 32>}, {pipeline_mode = #tpu.pipeline_mode<synchronous>, transform_indices = @transform_13, window_bounds = array<i64: 32, 32>}, {pipeline_mode = #tpu.pipeline_mode<synchronous>, transform_indices = @transform_14, window_bounds = array<i64: 32, 32>}, {pipeline_mode = #tpu.pipeline_mode<synchronous>, transform_indices = @transform_15, window_bounds = array<i64: 1, 32>}, {pipeline_mode = #tpu.pipeline_mode<synchronous>, transform_indices = @transform_16, window_bounds = array<i64: 1, 32>}, {pipeline_mode = #tpu.pipeline_mode<synchronous>, transform_indices = @transform_17, window_bounds = array<i64: 3, 32, 32>}, {pipeline_mode = #tpu.pipeline_mode<synchronous>, transform_indices = @transform_18, window_bounds = array<i64: 3, 32, 32>}, {pipeline_mode = #tpu.pipeline_mode<synchronous>, transform_indices = @transform_19, window_bounds = array<i64: 3, 1, 32>}, {pipeline_mode = #tpu.pipeline_mode<synchronous>, transform_indices = @transform_20, window_bounds = array<i64: 3, 1, 32>}, {transform_indices = @transform_21, window_bounds = array<i64: 1, 8, 48>}, {transform_indices = @transform_22, window_bounds = array<i64: 1, 8, 96>}]} {
    %c0_i32 = arith.constant 0 : i32
    %0 = arith.cmpi eq, %arg0, %c0_i32 : i32
    %1 = arith.extui %0 : i1 to i32
    %c0_i32_0 = arith.constant 0 : i32
    %2 = arith.cmpi ne, %1, %c0_i32_0 : i32
    scf.if %2 {
      %c0_153 = arith.constant 0 : index
      %c0_154 = arith.constant 0 : index
      %233 = vector.load %arg2[%c0_153, %c0_154] : memref<8x16xf32, #tpu.memory_space<vmem>>, vector<8x16xf32>
      %c0_155 = arith.constant 0 : index
      %c0_156 = arith.constant 0 : index
      %234 = vector.load %arg24[%c0_155, %c0_156] : memref<8x16xf32, #tpu.memory_space<vmem>>, vector<8x16xf32>
      tpu.vector_store %arg24[%c0_155, %c0_156], %233 {strides = array<i32>} : memref<8x16xf32, #tpu.memory_space<vmem>>, vector<8x16xf32>,
      %c0_157 = arith.constant 0 : index
      %c0_158 = arith.constant 0 : index
      %235 = vector.load %arg3[%c0_157, %c0_158] : memref<8x32xf32, #tpu.memory_space<vmem>>, vector<8x32xf32>
      %c0_159 = arith.constant 0 : index
      %c0_160 = arith.constant 0 : index
      %236 = vector.load %arg25[%c0_159, %c0_160] : memref<8x32xf32, #tpu.memory_space<vmem>>, vector<8x32xf32>
      tpu.vector_store %arg25[%c0_159, %c0_160], %235 {strides = array<i32>} : memref<8x32xf32, #tpu.memory_space<vmem>>, vector<8x32xf32>,
    } else {
    }
    %c0 = arith.constant 0 : index
    %c0_1 = arith.constant 0 : index
    %c0_2 = arith.constant 0 : index
    %3 = vector.load %arg1[%c0, %c0_1, %c0_2] : memref<1x8x32xf32, #tpu.memory_space<vmem>>, vector<1x8x32xf32>
    %4 = vector.shape_cast %3 : vector<1x8x32xf32> to vector<8x32xf32>
    %c0_3 = arith.constant 0 : index
    %c0_4 = arith.constant 0 : index
    %5 = vector.load %arg24[%c0_3, %c0_4] : memref<8x16xf32, #tpu.memory_space<vmem>>, vector<8x16xf32>
    %c0_5 = arith.constant 0 : index
    %c0_6 = arith.constant 0 : index
    %6 = vector.load %arg25[%c0_5, %c0_6] : memref<8x32xf32, #tpu.memory_space<vmem>>, vector<8x32xf32>
    %cst = arith.constant 0.000000e+00 : f32
    %cst_7 = arith.constant 1.000000e+00 : f32
    %7 = arith.select %0, %cst, %cst_7 : f32
    %c0_8 = arith.constant 0 : index
    %c0_9 = arith.constant 0 : index
    %8 = vector.load %arg4[%c0_8, %c0_9] : memref<32x16xf32, #tpu.memory_space<vmem>>, vector<32x16xf32>
    %cst_10 = arith.constant dense<0.000000e+00> : vector<8x16xf32>
    %9 = tpu.matmul %4, %8, %cst_10 {dimension_numbers = #tpu.dot_dimension_numbers<[1], [0], [0], [1], [0, 0, 1, 1], [], []>} : vector<8x32xf32>, vector<32x16xf32>, vector<8x16xf32> -> vector<8x16xf32>
    %c0_11 = arith.constant 0 : index
    %c0_12 = arith.constant 0 : index
    %10 = vector.load %arg6[%c0_11, %c0_12] : memref<1x16xf32, #tpu.memory_space<vmem>>, vector<1x16xf32>
    %11 = vector.broadcast %10 : vector<1x16xf32> to vector<8x16xf32>
    %12 = arith.addf %9, %11 : vector<8x16xf32>
    %c0_13 = arith.constant 0 : index
    %c0_14 = arith.constant 0 : index
    %c0_15 = arith.constant 0 : index
    %13 = vector.load %arg8[%c0_13, %c0_14, %c0_15] : memref<3x16x16xf32, #tpu.memory_space<vmem>>, vector<1x16x16xf32>
    %14 = vector.shape_cast %13 : vector<1x16x16xf32> to vector<16x16xf32>
    %cst_16 = arith.constant dense<0.000000e+00> : vector<8x16xf32>
    %15 = tpu.matmul %5, %14, %cst_16 {dimension_numbers = #tpu.dot_dimension_numbers<[1], [0], [0], [1], [0, 0, 1, 1], [], []>} : vector<8x16xf32>, vector<16x16xf32>, vector<8x16xf32> -> vector<8x16xf32>
    %16 = arith.addf %12, %15 : vector<8x16xf32>
    %c0_17 = arith.constant 0 : index
    %c0_18 = arith.constant 0 : index
    %c0_19 = arith.constant 0 : index
    %17 = vector.load %arg10[%c0_17, %c0_18, %c0_19] : memref<3x1x16xf32, #tpu.memory_space<vmem>>, vector<1x1x16xf32>
    %18 = vector.shape_cast %17 : vector<1x1x16xf32> to vector<1x16xf32>
    %19 = vector.broadcast %7 : f32 to vector<1x16xf32>
    %20 = arith.mulf %19, %18 : vector<1x16xf32>
    %21 = vector.broadcast %20 : vector<1x16xf32> to vector<8x16xf32>
    %22 = arith.addf %16, %21 : vector<8x16xf32>
    %c0_20 = arith.constant 0 : index
    %c0_21 = arith.constant 0 : index
    %23 = vector.load %arg5[%c0_20, %c0_21] : memref<32x16xf32, #tpu.memory_space<vmem>>, vector<32x16xf32>
    %cst_22 = arith.constant dense<0.000000e+00> : vector<8x16xf32>
    %24 = tpu.matmul %4, %23, %cst_22 {dimension_numbers = #tpu.dot_dimension_numbers<[1], [0], [0], [1], [0, 0, 1, 1], [], []>} : vector<8x32xf32>, vector<32x16xf32>, vector<8x16xf32> -> vector<8x16xf32>
    %c0_23 = arith.constant 0 : index
    %c0_24 = arith.constant 0 : index
    %25 = vector.load %arg7[%c0_23, %c0_24] : memref<1x16xf32, #tpu.memory_space<vmem>>, vector<1x16xf32>
    %26 = vector.broadcast %25 : vector<1x16xf32> to vector<8x16xf32>
    %27 = arith.addf %24, %26 : vector<8x16xf32>
    %c0_25 = arith.constant 0 : index
    %c0_26 = arith.constant 0 : index
    %c0_27 = arith.constant 0 : index
    %28 = vector.load %arg9[%c0_25, %c0_26, %c0_27] : memref<3x16x16xf32, #tpu.memory_space<vmem>>, vector<1x16x16xf32>
    %29 = vector.shape_cast %28 : vector<1x16x16xf32> to vector<16x16xf32>
    %cst_28 = arith.constant dense<0.000000e+00> : vector<8x16xf32>
    %30 = tpu.matmul %5, %29, %cst_28 {dimension_numbers = #tpu.dot_dimension_numbers<[1], [0], [0], [1], [0, 0, 1, 1], [], []>} : vector<8x16xf32>, vector<16x16xf32>, vector<8x16xf32> -> vector<8x16xf32>
    %31 = arith.addf %27, %30 : vector<8x16xf32>
    %c0_29 = arith.constant 0 : index
    %c0_30 = arith.constant 0 : index
    %c0_31 = arith.constant 0 : index
    %32 = vector.load %arg11[%c0_29, %c0_30, %c0_31] : memref<3x1x16xf32, #tpu.memory_space<vmem>>, vector<1x1x16xf32>
    %33 = vector.shape_cast %32 : vector<1x1x16xf32> to vector<1x16xf32>
    %34 = vector.broadcast %7 : f32 to vector<1x16xf32>
    %35 = arith.mulf %34, %33 : vector<1x16xf32>
    %36 = vector.broadcast %35 : vector<1x16xf32> to vector<8x16xf32>
    %37 = arith.addf %31, %36 : vector<8x16xf32>
    %38 = arith.negf %37 : vector<8x16xf32>
    %39 = math.exp %38 : vector<8x16xf32>
    %cst_32 = arith.constant 1.000000e+00 : f32
    %40 = vector.broadcast %cst_32 : f32 to vector<8x16xf32>
    %41 = arith.addf %40, %39 : vector<8x16xf32>
    %42 = arith.divf %40, %41 : vector<8x16xf32>
    %43 = math.tanh %22 : vector<8x16xf32>
    %44 = arith.mulf %43, %42 : vector<8x16xf32>
    %cst_33 = arith.constant 1.000000e+00 : f32
    %45 = vector.broadcast %cst_33 : f32 to vector<8x16xf32>
    %46 = arith.subf %45, %42 : vector<8x16xf32>
    %47 = arith.mulf %5, %46 : vector<8x16xf32>
    %48 = arith.addf %44, %47 : vector<8x16xf32>
    %c1 = arith.constant 1 : index
    %c0_34 = arith.constant 0 : index
    %c0_35 = arith.constant 0 : index
    %49 = vector.load %arg8[%c1, %c0_34, %c0_35] : memref<3x16x16xf32, #tpu.memory_space<vmem>>, vector<1x16x16xf32>
    %50 = vector.shape_cast %49 : vector<1x16x16xf32> to vector<16x16xf32>
    %cst_36 = arith.constant dense<0.000000e+00> : vector<8x16xf32>
    %51 = tpu.matmul %48, %50, %cst_36 {dimension_numbers = #tpu.dot_dimension_numbers<[1], [0], [0], [1], [0, 0, 1, 1], [], []>} : vector<8x16xf32>, vector<16x16xf32>, vector<8x16xf32> -> vector<8x16xf32>
    %c1_37 = arith.constant 1 : index
    %c0_38 = arith.constant 0 : index
    %c0_39 = arith.constant 0 : index
    %52 = vector.load %arg10[%c1_37, %c0_38, %c0_39] : memref<3x1x16xf32, #tpu.memory_space<vmem>>, vector<1x1x16xf32>
    %53 = vector.shape_cast %52 : vector<1x1x16xf32> to vector<1x16xf32>
    %54 = vector.broadcast %53 : vector<1x16xf32> to vector<8x16xf32>
    %55 = arith.addf %51, %54 : vector<8x16xf32>
    %c1_40 = arith.constant 1 : index
    %c0_41 = arith.constant 0 : index
    %c0_42 = arith.constant 0 : index
    %56 = vector.load %arg9[%c1_40, %c0_41, %c0_42] : memref<3x16x16xf32, #tpu.memory_space<vmem>>, vector<1x16x16xf32>
    %57 = vector.shape_cast %56 : vector<1x16x16xf32> to vector<16x16xf32>
    %cst_43 = arith.constant dense<0.000000e+00> : vector<8x16xf32>
    %58 = tpu.matmul %48, %57, %cst_43 {dimension_numbers = #tpu.dot_dimension_numbers<[1], [0], [0], [1], [0, 0, 1, 1], [], []>} : vector<8x16xf32>, vector<16x16xf32>, vector<8x16xf32> -> vector<8x16xf32>
    %c1_44 = arith.constant 1 : index
    %c0_45 = arith.constant 0 : index
    %c0_46 = arith.constant 0 : index
    %59 = vector.load %arg11[%c1_44, %c0_45, %c0_46] : memref<3x1x16xf32, #tpu.memory_space<vmem>>, vector<1x1x16xf32>
    %60 = vector.shape_cast %59 : vector<1x1x16xf32> to vector<1x16xf32>
    %61 = vector.broadcast %60 : vector<1x16xf32> to vector<8x16xf32>
    %62 = arith.addf %58, %61 : vector<8x16xf32>
    %63 = arith.negf %62 : vector<8x16xf32>
    %64 = math.exp %63 : vector<8x16xf32>
    %cst_47 = arith.constant 1.000000e+00 : f32
    %65 = vector.broadcast %cst_47 : f32 to vector<8x16xf32>
    %66 = arith.addf %65, %64 : vector<8x16xf32>
    %67 = arith.divf %65, %66 : vector<8x16xf32>
    %68 = math.tanh %55 : vector<8x16xf32>
    %69 = arith.mulf %68, %67 : vector<8x16xf32>
    %cst_48 = arith.constant 1.000000e+00 : f32
    %70 = vector.broadcast %cst_48 : f32 to vector<8x16xf32>
    %71 = arith.subf %70, %67 : vector<8x16xf32>
    %72 = arith.mulf %48, %71 : vector<8x16xf32>
    %73 = arith.addf %69, %72 : vector<8x16xf32>
    %c2 = arith.constant 2 : index
    %c0_49 = arith.constant 0 : index
    %c0_50 = arith.constant 0 : index
    %74 = vector.load %arg8[%c2, %c0_49, %c0_50] : memref<3x16x16xf32, #tpu.memory_space<vmem>>, vector<1x16x16xf32>
    %75 = vector.shape_cast %74 : vector<1x16x16xf32> to vector<16x16xf32>
    %cst_51 = arith.constant dense<0.000000e+00> : vector<8x16xf32>
    %76 = tpu.matmul %73, %75, %cst_51 {dimension_numbers = #tpu.dot_dimension_numbers<[1], [0], [0], [1], [0, 0, 1, 1], [], []>} : vector<8x16xf32>, vector<16x16xf32>, vector<8x16xf32> -> vector<8x16xf32>
    %c2_52 = arith.constant 2 : index
    %c0_53 = arith.constant 0 : index
    %c0_54 = arith.constant 0 : index
    %77 = vector.load %arg10[%c2_52, %c0_53, %c0_54] : memref<3x1x16xf32, #tpu.memory_space<vmem>>, vector<1x1x16xf32>
    %78 = vector.shape_cast %77 : vector<1x1x16xf32> to vector<1x16xf32>
    %79 = vector.broadcast %78 : vector<1x16xf32> to vector<8x16xf32>
    %80 = arith.addf %76, %79 : vector<8x16xf32>
    %c2_55 = arith.constant 2 : index
    %c0_56 = arith.constant 0 : index
    %c0_57 = arith.constant 0 : index
    %81 = vector.load %arg9[%c2_55, %c0_56, %c0_57] : memref<3x16x16xf32, #tpu.memory_space<vmem>>, vector<1x16x16xf32>
    %82 = vector.shape_cast %81 : vector<1x16x16xf32> to vector<16x16xf32>
    %cst_58 = arith.constant dense<0.000000e+00> : vector<8x16xf32>
    %83 = tpu.matmul %73, %82, %cst_58 {dimension_numbers = #tpu.dot_dimension_numbers<[1], [0], [0], [1], [0, 0, 1, 1], [], []>} : vector<8x16xf32>, vector<16x16xf32>, vector<8x16xf32> -> vector<8x16xf32>
    %c2_59 = arith.constant 2 : index
    %c0_60 = arith.constant 0 : index
    %c0_61 = arith.constant 0 : index
    %84 = vector.load %arg11[%c2_59, %c0_60, %c0_61] : memref<3x1x16xf32, #tpu.memory_space<vmem>>, vector<1x1x16xf32>
    %85 = vector.shape_cast %84 : vector<1x1x16xf32> to vector<1x16xf32>
    %86 = vector.broadcast %85 : vector<1x16xf32> to vector<8x16xf32>
    %87 = arith.addf %83, %86 : vector<8x16xf32>
    %88 = arith.negf %87 : vector<8x16xf32>
    %89 = math.exp %88 : vector<8x16xf32>
    %cst_62 = arith.constant 1.000000e+00 : f32
    %90 = vector.broadcast %cst_62 : f32 to vector<8x16xf32>
    %91 = arith.addf %90, %89 : vector<8x16xf32>
    %92 = arith.divf %90, %91 : vector<8x16xf32>
    %93 = math.tanh %80 : vector<8x16xf32>
    %94 = arith.mulf %93, %92 : vector<8x16xf32>
    %cst_63 = arith.constant 1.000000e+00 : f32
    %95 = vector.broadcast %cst_63 : f32 to vector<8x16xf32>
    %96 = arith.subf %95, %92 : vector<8x16xf32>
    %97 = arith.mulf %73, %96 : vector<8x16xf32>
    %98 = arith.addf %94, %97 : vector<8x16xf32>
    %c0_64 = arith.constant 0 : index
    %c0_65 = arith.constant 0 : index
    %c0_66 = arith.constant 0 : index
    %99 = vector.load %arg12[%c0_64, %c0_65, %c0_66] : memref<3x16x32xf32, #tpu.memory_space<vmem>>, vector<1x16x32xf32>
    %100 = vector.shape_cast %99 : vector<1x16x32xf32> to vector<16x32xf32>
    %cst_67 = arith.constant dense<0.000000e+00> : vector<8x32xf32>
    %101 = tpu.matmul %48, %100, %cst_67 {dimension_numbers = #tpu.dot_dimension_numbers<[1], [0], [0], [1], [0, 0, 1, 1], [], []>} : vector<8x16xf32>, vector<16x32xf32>, vector<8x32xf32> -> vector<8x32xf32>
    %c0_68 = arith.constant 0 : index
    %c0_69 = arith.constant 0 : index
    %c0_70 = arith.constant 0 : index
    %102 = vector.load %arg13[%c0_68, %c0_69, %c0_70] : memref<3x1x32xf32, #tpu.memory_space<vmem>>, vector<1x1x32xf32>
    %103 = vector.shape_cast %102 : vector<1x1x32xf32> to vector<1x32xf32>
    %104 = vector.broadcast %103 : vector<1x32xf32> to vector<8x32xf32>
    %105 = arith.addf %101, %104 : vector<8x32xf32>
    %c1_71 = arith.constant 1 : index
    %c0_72 = arith.constant 0 : index
    %c0_73 = arith.constant 0 : index
    %106 = vector.load %arg12[%c1_71, %c0_72, %c0_73] : memref<3x16x32xf32, #tpu.memory_space<vmem>>, vector<1x16x32xf32>
    %107 = vector.shape_cast %106 : vector<1x16x32xf32> to vector<16x32xf32>
    %cst_74 = arith.constant dense<0.000000e+00> : vector<8x32xf32>
    %108 = tpu.matmul %73, %107, %cst_74 {dimension_numbers = #tpu.dot_dimension_numbers<[1], [0], [0], [1], [0, 0, 1, 1], [], []>} : vector<8x16xf32>, vector<16x32xf32>, vector<8x32xf32> -> vector<8x32xf32>
    %c1_75 = arith.constant 1 : index
    %c0_76 = arith.constant 0 : index
    %c0_77 = arith.constant 0 : index
    %109 = vector.load %arg13[%c1_75, %c0_76, %c0_77] : memref<3x1x32xf32, #tpu.memory_space<vmem>>, vector<1x1x32xf32>
    %110 = vector.shape_cast %109 : vector<1x1x32xf32> to vector<1x32xf32>
    %111 = vector.broadcast %110 : vector<1x32xf32> to vector<8x32xf32>
    %112 = arith.addf %108, %111 : vector<8x32xf32>
    %c2_78 = arith.constant 2 : index
    %c0_79 = arith.constant 0 : index
    %c0_80 = arith.constant 0 : index
    %113 = vector.load %arg12[%c2_78, %c0_79, %c0_80] : memref<3x16x32xf32, #tpu.memory_space<vmem>>, vector<1x16x32xf32>
    %114 = vector.shape_cast %113 : vector<1x16x32xf32> to vector<16x32xf32>
    %cst_81 = arith.constant dense<0.000000e+00> : vector<8x32xf32>
    %115 = tpu.matmul %98, %114, %cst_81 {dimension_numbers = #tpu.dot_dimension_numbers<[1], [0], [0], [1], [0, 0, 1, 1], [], []>} : vector<8x16xf32>, vector<16x32xf32>, vector<8x32xf32> -> vector<8x32xf32>
    %c2_82 = arith.constant 2 : index
    %c0_83 = arith.constant 0 : index
    %c0_84 = arith.constant 0 : index
    %116 = vector.load %arg13[%c2_82, %c0_83, %c0_84] : memref<3x1x32xf32, #tpu.memory_space<vmem>>, vector<1x1x32xf32>
    %117 = vector.shape_cast %116 : vector<1x1x32xf32> to vector<1x32xf32>
    %118 = vector.broadcast %117 : vector<1x32xf32> to vector<8x32xf32>
    %119 = arith.addf %115, %118 : vector<8x32xf32>
    %c0_85 = arith.constant 0 : index
    %c0_86 = arith.constant 0 : index
    %120 = vector.load %arg14[%c0_85, %c0_86] : memref<32x32xf32, #tpu.memory_space<vmem>>, vector<32x32xf32>
    %cst_87 = arith.constant dense<0.000000e+00> : vector<8x32xf32>
    %121 = tpu.matmul %4, %120, %cst_87 {dimension_numbers = #tpu.dot_dimension_numbers<[1], [0], [0], [1], [0, 0, 1, 1], [], []>} : vector<8x32xf32>, vector<32x32xf32>, vector<8x32xf32> -> vector<8x32xf32>
    %122 = arith.mulf %121, %105 : vector<8x32xf32>
    %c0_88 = arith.constant 0 : index
    %c0_89 = arith.constant 0 : index
    %123 = vector.load %arg16[%c0_88, %c0_89] : memref<1x32xf32, #tpu.memory_space<vmem>>, vector<1x32xf32>
    %124 = vector.broadcast %123 : vector<1x32xf32> to vector<8x32xf32>
    %125 = arith.addf %122, %124 : vector<8x32xf32>
    %c0_90 = arith.constant 0 : index
    %c0_91 = arith.constant 0 : index
    %c0_92 = arith.constant 0 : index
    %126 = vector.load %arg18[%c0_90, %c0_91, %c0_92] : memref<3x32x32xf32, #tpu.memory_space<vmem>>, vector<1x32x32xf32>
    %127 = vector.shape_cast %126 : vector<1x32x32xf32> to vector<32x32xf32>
    %cst_93 = arith.constant dense<0.000000e+00> : vector<8x32xf32>
    %128 = tpu.matmul %6, %127, %cst_93 {dimension_numbers = #tpu.dot_dimension_numbers<[1], [0], [0], [1], [0, 0, 1, 1], [], []>} : vector<8x32xf32>, vector<32x32xf32>, vector<8x32xf32> -> vector<8x32xf32>
    %129 = arith.mulf %128, %105 : vector<8x32xf32>
    %130 = vector.broadcast %7 : f32 to vector<8x32xf32>
    %131 = arith.mulf %130, %129 : vector<8x32xf32>
    %132 = arith.addf %125, %131 : vector<8x32xf32>
    %c0_94 = arith.constant 0 : index
    %c0_95 = arith.constant 0 : index
    %c0_96 = arith.constant 0 : index
    %133 = vector.load %arg20[%c0_94, %c0_95, %c0_96] : memref<3x1x32xf32, #tpu.memory_space<vmem>>, vector<1x1x32xf32>
    %134 = vector.shape_cast %133 : vector<1x1x32xf32> to vector<1x32xf32>
    %135 = vector.broadcast %7 : f32 to vector<1x32xf32>
    %136 = arith.mulf %135, %134 : vector<1x32xf32>
    %137 = vector.broadcast %136 : vector<1x32xf32> to vector<8x32xf32>
    %138 = arith.addf %132, %137 : vector<8x32xf32>
    %c0_97 = arith.constant 0 : index
    %c0_98 = arith.constant 0 : index
    %139 = vector.load %arg15[%c0_97, %c0_98] : memref<32x32xf32, #tpu.memory_space<vmem>>, vector<32x32xf32>
    %cst_99 = arith.constant dense<0.000000e+00> : vector<8x32xf32>
    %140 = tpu.matmul %4, %139, %cst_99 {dimension_numbers = #tpu.dot_dimension_numbers<[1], [0], [0], [1], [0, 0, 1, 1], [], []>} : vector<8x32xf32>, vector<32x32xf32>, vector<8x32xf32> -> vector<8x32xf32>
    %141 = arith.mulf %140, %105 : vector<8x32xf32>
    %c0_100 = arith.constant 0 : index
    %c0_101 = arith.constant 0 : index
    %142 = vector.load %arg17[%c0_100, %c0_101] : memref<1x32xf32, #tpu.memory_space<vmem>>, vector<1x32xf32>
    %143 = vector.broadcast %142 : vector<1x32xf32> to vector<8x32xf32>
    %144 = arith.addf %141, %143 : vector<8x32xf32>
    %c0_102 = arith.constant 0 : index
    %c0_103 = arith.constant 0 : index
    %c0_104 = arith.constant 0 : index
    %145 = vector.load %arg19[%c0_102, %c0_103, %c0_104] : memref<3x32x32xf32, #tpu.memory_space<vmem>>, vector<1x32x32xf32>
    %146 = vector.shape_cast %145 : vector<1x32x32xf32> to vector<32x32xf32>
    %cst_105 = arith.constant dense<0.000000e+00> : vector<8x32xf32>
    %147 = tpu.matmul %6, %146, %cst_105 {dimension_numbers = #tpu.dot_dimension_numbers<[1], [0], [0], [1], [0, 0, 1, 1], [], []>} : vector<8x32xf32>, vector<32x32xf32>, vector<8x32xf32> -> vector<8x32xf32>
    %148 = arith.mulf %147, %105 : vector<8x32xf32>
    %149 = vector.broadcast %7 : f32 to vector<8x32xf32>
    %150 = arith.mulf %149, %148 : vector<8x32xf32>
    %151 = arith.addf %144, %150 : vector<8x32xf32>
    %c0_106 = arith.constant 0 : index
    %c0_107 = arith.constant 0 : index
    %c0_108 = arith.constant 0 : index
    %152 = vector.load %arg21[%c0_106, %c0_107, %c0_108] : memref<3x1x32xf32, #tpu.memory_space<vmem>>, vector<1x1x32xf32>
    %153 = vector.shape_cast %152 : vector<1x1x32xf32> to vector<1x32xf32>
    %154 = vector.broadcast %7 : f32 to vector<1x32xf32>
    %155 = arith.mulf %154, %153 : vector<1x32xf32>
    %156 = vector.broadcast %155 : vector<1x32xf32> to vector<8x32xf32>
    %157 = arith.addf %151, %156 : vector<8x32xf32>
    %158 = arith.negf %157 : vector<8x32xf32>
    %159 = math.exp %158 : vector<8x32xf32>
    %cst_109 = arith.constant 1.000000e+00 : f32
    %160 = vector.broadcast %cst_109 : f32 to vector<8x32xf32>
    %161 = arith.addf %160, %159 : vector<8x32xf32>
    %162 = arith.divf %160, %161 : vector<8x32xf32>
    %163 = math.tanh %138 : vector<8x32xf32>
    %164 = arith.mulf %163, %162 : vector<8x32xf32>
    %cst_110 = arith.constant 1.000000e+00 : f32
    %165 = vector.broadcast %cst_110 : f32 to vector<8x32xf32>
    %166 = arith.subf %165, %162 : vector<8x32xf32>
    %167 = arith.mulf %6, %166 : vector<8x32xf32>
    %168 = arith.addf %164, %167 : vector<8x32xf32>
    %c1_111 = arith.constant 1 : index
    %c0_112 = arith.constant 0 : index
    %c0_113 = arith.constant 0 : index
    %169 = vector.load %arg18[%c1_111, %c0_112, %c0_113] : memref<3x32x32xf32, #tpu.memory_space<vmem>>, vector<1x32x32xf32>
    %170 = vector.shape_cast %169 : vector<1x32x32xf32> to vector<32x32xf32>
    %cst_114 = arith.constant dense<0.000000e+00> : vector<8x32xf32>
    %171 = tpu.matmul %168, %170, %cst_114 {dimension_numbers = #tpu.dot_dimension_numbers<[1], [0], [0], [1], [0, 0, 1, 1], [], []>} : vector<8x32xf32>, vector<32x32xf32>, vector<8x32xf32> -> vector<8x32xf32>
    %172 = arith.mulf %171, %112 : vector<8x32xf32>
    %c1_115 = arith.constant 1 : index
    %c0_116 = arith.constant 0 : index
    %c0_117 = arith.constant 0 : index
    %173 = vector.load %arg20[%c1_115, %c0_116, %c0_117] : memref<3x1x32xf32, #tpu.memory_space<vmem>>, vector<1x1x32xf32>
    %174 = vector.shape_cast %173 : vector<1x1x32xf32> to vector<1x32xf32>
    %175 = vector.broadcast %174 : vector<1x32xf32> to vector<8x32xf32>
    %176 = arith.addf %172, %175 : vector<8x32xf32>
    %c1_118 = arith.constant 1 : index
    %c0_119 = arith.constant 0 : index
    %c0_120 = arith.constant 0 : index
    %177 = vector.load %arg19[%c1_118, %c0_119, %c0_120] : memref<3x32x32xf32, #tpu.memory_space<vmem>>, vector<1x32x32xf32>
    %178 = vector.shape_cast %177 : vector<1x32x32xf32> to vector<32x32xf32>
    %cst_121 = arith.constant dense<0.000000e+00> : vector<8x32xf32>
    %179 = tpu.matmul %168, %178, %cst_121 {dimension_numbers = #tpu.dot_dimension_numbers<[1], [0], [0], [1], [0, 0, 1, 1], [], []>} : vector<8x32xf32>, vector<32x32xf32>, vector<8x32xf32> -> vector<8x32xf32>
    %180 = arith.mulf %179, %112 : vector<8x32xf32>
    %c1_122 = arith.constant 1 : index
    %c0_123 = arith.constant 0 : index
    %c0_124 = arith.constant 0 : index
    %181 = vector.load %arg21[%c1_122, %c0_123, %c0_124] : memref<3x1x32xf32, #tpu.memory_space<vmem>>, vector<1x1x32xf32>
    %182 = vector.shape_cast %181 : vector<1x1x32xf32> to vector<1x32xf32>
    %183 = vector.broadcast %182 : vector<1x32xf32> to vector<8x32xf32>
    %184 = arith.addf %180, %183 : vector<8x32xf32>
    %185 = arith.negf %184 : vector<8x32xf32>
    %186 = math.exp %185 : vector<8x32xf32>
    %cst_125 = arith.constant 1.000000e+00 : f32
    %187 = vector.broadcast %cst_125 : f32 to vector<8x32xf32>
    %188 = arith.addf %187, %186 : vector<8x32xf32>
    %189 = arith.divf %187, %188 : vector<8x32xf32>
    %190 = math.tanh %176 : vector<8x32xf32>
    %191 = arith.mulf %190, %189 : vector<8x32xf32>
    %cst_126 = arith.constant 1.000000e+00 : f32
    %192 = vector.broadcast %cst_126 : f32 to vector<8x32xf32>
    %193 = arith.subf %192, %189 : vector<8x32xf32>
    %194 = arith.mulf %168, %193 : vector<8x32xf32>
    %195 = arith.addf %191, %194 : vector<8x32xf32>
    %c2_127 = arith.constant 2 : index
    %c0_128 = arith.constant 0 : index
    %c0_129 = arith.constant 0 : index
    %196 = vector.load %arg18[%c2_127, %c0_128, %c0_129] : memref<3x32x32xf32, #tpu.memory_space<vmem>>, vector<1x32x32xf32>
    %197 = vector.shape_cast %196 : vector<1x32x32xf32> to vector<32x32xf32>
    %cst_130 = arith.constant dense<0.000000e+00> : vector<8x32xf32>
    %198 = tpu.matmul %195, %197, %cst_130 {dimension_numbers = #tpu.dot_dimension_numbers<[1], [0], [0], [1], [0, 0, 1, 1], [], []>} : vector<8x32xf32>, vector<32x32xf32>, vector<8x32xf32> -> vector<8x32xf32>
    %199 = arith.mulf %198, %119 : vector<8x32xf32>
    %c2_131 = arith.constant 2 : index
    %c0_132 = arith.constant 0 : index
    %c0_133 = arith.constant 0 : index
    %200 = vector.load %arg20[%c2_131, %c0_132, %c0_133] : memref<3x1x32xf32, #tpu.memory_space<vmem>>, vector<1x1x32xf32>
    %201 = vector.shape_cast %200 : vector<1x1x32xf32> to vector<1x32xf32>
    %202 = vector.broadcast %201 : vector<1x32xf32> to vector<8x32xf32>
    %203 = arith.addf %199, %202 : vector<8x32xf32>
    %c2_134 = arith.constant 2 : index
    %c0_135 = arith.constant 0 : index
    %c0_136 = arith.constant 0 : index
    %204 = vector.load %arg19[%c2_134, %c0_135, %c0_136] : memref<3x32x32xf32, #tpu.memory_space<vmem>>, vector<1x32x32xf32>
    %205 = vector.shape_cast %204 : vector<1x32x32xf32> to vector<32x32xf32>
    %cst_137 = arith.constant dense<0.000000e+00> : vector<8x32xf32>
    %206 = tpu.matmul %195, %205, %cst_137 {dimension_numbers = #tpu.dot_dimension_numbers<[1], [0], [0], [1], [0, 0, 1, 1], [], []>} : vector<8x32xf32>, vector<32x32xf32>, vector<8x32xf32> -> vector<8x32xf32>
    %207 = arith.mulf %206, %119 : vector<8x32xf32>
    %c2_138 = arith.constant 2 : index
    %c0_139 = arith.constant 0 : index
    %c0_140 = arith.constant 0 : index
    %208 = vector.load %arg21[%c2_138, %c0_139, %c0_140] : memref<3x1x32xf32, #tpu.memory_space<vmem>>, vector<1x1x32xf32>
    %209 = vector.shape_cast %208 : vector<1x1x32xf32> to vector<1x32xf32>
    %210 = vector.broadcast %209 : vector<1x32xf32> to vector<8x32xf32>
    %211 = arith.addf %207, %210 : vector<8x32xf32>
    %212 = arith.negf %211 : vector<8x32xf32>
    %213 = math.exp %212 : vector<8x32xf32>
    %cst_141 = arith.constant 1.000000e+00 : f32
    %214 = vector.broadcast %cst_141 : f32 to vector<8x32xf32>
    %215 = arith.addf %214, %213 : vector<8x32xf32>
    %216 = arith.divf %214, %215 : vector<8x32xf32>
    %217 = math.tanh %203 : vector<8x32xf32>
    %218 = arith.mulf %217, %216 : vector<8x32xf32>
    %cst_142 = arith.constant 1.000000e+00 : f32
    %219 = vector.broadcast %cst_142 : f32 to vector<8x32xf32>
    %220 = arith.subf %219, %216 : vector<8x32xf32>
    %221 = arith.mulf %195, %220 : vector<8x32xf32>
    %222 = arith.addf %218, %221 : vector<8x32xf32>
    %c0_143 = arith.constant 0 : index
    %c0_144 = arith.constant 0 : index
    %223 = vector.load %arg24[%c0_143, %c0_144] : memref<8x16xf32, #tpu.memory_space<vmem>>, vector<8x16xf32>
    tpu.vector_store %arg24[%c0_143, %c0_144], %98 {strides = array<i32>} : memref<8x16xf32, #tpu.memory_space<vmem>>, vector<8x16xf32>,
    %c0_145 = arith.constant 0 : index
    %c0_146 = arith.constant 0 : index
    %224 = vector.load %arg25[%c0_145, %c0_146] : memref<8x32xf32, #tpu.memory_space<vmem>>, vector<8x32xf32>
    tpu.vector_store %arg25[%c0_145, %c0_146], %222 {strides = array<i32>} : memref<8x32xf32, #tpu.memory_space<vmem>>, vector<8x32xf32>,
    %225 = tpu.concatenate %48, %73, %98 in 1 : vector<8x16xf32>, vector<8x16xf32>, vector<8x16xf32> -> vector<8x48xf32>
    %c0_147 = arith.constant 0 : index
    %c0_148 = arith.constant 0 : index
    %c0_149 = arith.constant 0 : index
    %226 = vector.load %arg22[%c0_147, %c0_148, %c0_149] : memref<1x8x48xf32, #tpu.memory_space<vmem>>, vector<1x8x48xf32>
    %227 = vector.shape_cast %226 : vector<1x8x48xf32> to vector<8x48xf32>
    %228 = vector.shape_cast %225 : vector<8x48xf32> to vector<1x8x48xf32>
    tpu.vector_store %arg22[%c0_147, %c0_148, %c0_149], %228 {strides = array<i32>} : memref<1x8x48xf32, #tpu.memory_space<vmem>>, vector<1x8x48xf32>,
    %229 = tpu.concatenate %168, %195, %222 in 1 : vector<8x32xf32>, vector<8x32xf32>, vector<8x32xf32> -> vector<8x96xf32>
    %c0_150 = arith.constant 0 : index
    %c0_151 = arith.constant 0 : index
    %c0_152 = arith.constant 0 : index
    %230 = vector.load %arg23[%c0_150, %c0_151, %c0_152] : memref<1x8x96xf32, #tpu.memory_space<vmem>>, vector<1x8x96xf32>
    %231 = vector.shape_cast %230 : vector<1x8x96xf32> to vector<8x96xf32>
    %232 = vector.shape_cast %229 : vector<8x96xf32> to vector<1x8x96xf32>
    tpu.vector_store %arg23[%c0_150, %c0_151, %c0_152], %232 {strides = array<i32>} : memref<1x8x96xf32, #tpu.memory_space<vmem>>, vector<1x8x96xf32>,
    return
  }
  func.func @transform_0(%arg0: i32) -> (i32, i32, i32) {
    %c0_i32 = arith.constant 0 : i32
    %c0_i32_0 = arith.constant 0 : i32
    %c0_i32_1 = arith.constant 0 : i32
    return %arg0, %c0_i32, %c0_i32_0 : i32, i32, i32
  }
  func.func @transform_1(%arg0: i32) -> (i32, i32) {
    %c0_i32 = arith.constant 0 : i32
    %c0_i32_0 = arith.constant 0 : i32
    %c0_i32_1 = arith.constant 0 : i32
    return %c0_i32, %c0_i32_0 : i32, i32
  }
  func.func @transform_2(%arg0: i32) -> (i32, i32) {
    %c0_i32 = arith.constant 0 : i32
    %c0_i32_0 = arith.constant 0 : i32
    %c0_i32_1 = arith.constant 0 : i32
    return %c0_i32, %c0_i32_0 : i32, i32
  }
  func.func @transform_3(%arg0: i32) -> (i32, i32) {
    %c0_i32 = arith.constant 0 : i32
    %c0_i32_0 = arith.constant 0 : i32
    %c0_i32_1 = arith.constant 0 : i32
    return %c0_i32, %c0_i32_0 : i32, i32
  }
  func.func @transform_4(%arg0: i32) -> (i32, i32) {
    %c0_i32 = arith.constant 0 : i32
    %c0_i32_0 = arith.constant 0 : i32
    %c0_i32_1 = arith.constant 0 : i32
    return %c0_i32, %c0_i32_0 : i32, i32
  }
  func.func @transform_5(%arg0: i32) -> (i32, i32) {
    %c0_i32 = arith.constant 0 : i32
    %c0_i32_0 = arith.constant 0 : i32
    %c0_i32_1 = arith.constant 0 : i32
    return %c0_i32, %c0_i32_0 : i32, i32
  }
  func.func @transform_6(%arg0: i32) -> (i32, i32) {
    %c0_i32 = arith.constant 0 : i32
    %c0_i32_0 = arith.constant 0 : i32
    %c0_i32_1 = arith.constant 0 : i32
    return %c0_i32, %c0_i32_0 : i32, i32
  }
  func.func @transform_7(%arg0: i32) -> (i32, i32, i32) {
    %c0_i32 = arith.constant 0 : i32
    %c0_i32_0 = arith.constant 0 : i32
    %c0_i32_1 = arith.constant 0 : i32
    %c0_i32_2 = arith.constant 0 : i32
    return %c0_i32, %c0_i32_0, %c0_i32_1 : i32, i32, i32
  }
  func.func @transform_8(%arg0: i32) -> (i32, i32, i32) {
    %c0_i32 = arith.constant 0 : i32
    %c0_i32_0 = arith.constant 0 : i32
    %c0_i32_1 = arith.constant 0 : i32
    %c0_i32_2 = arith.constant 0 : i32
    return %c0_i32, %c0_i32_0, %c0_i32_1 : i32, i32, i32
  }
  func.func @transform_9(%arg0: i32) -> (i32, i32, i32) {
    %c0_i32 = arith.constant 0 : i32
    %c0_i32_0 = arith.constant 0 : i32
    %c0_i32_1 = arith.constant 0 : i32
    %c0_i32_2 = arith.constant 0 : i32
    return %c0_i32, %c0_i32_0, %c0_i32_1 : i32, i32, i32
  }
  func.func @transform_10(%arg0: i32) -> (i32, i32, i32) {
    %c0_i32 = arith.constant 0 : i32
    %c0_i32_0 = arith.constant 0 : i32
    %c0_i32_1 = arith.constant 0 : i32
    %c0_i32_2 = arith.constant 0 : i32
    return %c0_i32, %c0_i32_0, %c0_i32_1 : i32, i32, i32
  }
  func.func @transform_11(%arg0: i32) -> (i32, i32, i32) {
    %c0_i32 = arith.constant 0 : i32
    %c0_i32_0 = arith.constant 0 : i32
    %c0_i32_1 = arith.constant 0 : i32
    %c0_i32_2 = arith.constant 0 : i32
    return %c0_i32, %c0_i32_0, %c0_i32_1 : i32, i32, i32
  }
  func.func @transform_12(%arg0: i32) -> (i32, i32, i32) {
    %c0_i32 = arith.constant 0 : i32
    %c0_i32_0 = arith.constant 0 : i32
    %c0_i32_1 = arith.constant 0 : i32
    %c0_i32_2 = arith.constant 0 : i32
    return %c0_i32, %c0_i32_0, %c0_i32_1 : i32, i32, i32
  }
  func.func @transform_13(%arg0: i32) -> (i32, i32) {
    %c0_i32 = arith.constant 0 : i32
    %c0_i32_0 = arith.constant 0 : i32
    %c0_i32_1 = arith.constant 0 : i32
    return %c0_i32, %c0_i32_0 : i32, i32
  }
  func.func @transform_14(%arg0: i32) -> (i32, i32) {
    %c0_i32 = arith.constant 0 : i32
    %c0_i32_0 = arith.constant 0 : i32
    %c0_i32_1 = arith.constant 0 : i32
    return %c0_i32, %c0_i32_0 : i32, i32
  }
  func.func @transform_15(%arg0: i32) -> (i32, i32) {
    %c0_i32 = arith.constant 0 : i32
    %c0_i32_0 = arith.constant 0 : i32
    %c0_i32_1 = arith.constant 0 : i32
    return %c0_i32, %c0_i32_0 : i32, i32
  }
  func.func @transform_16(%arg0: i32) -> (i32, i32) {
    %c0_i32 = arith.constant 0 : i32
    %c0_i32_0 = arith.constant 0 : i32
    %c0_i32_1 = arith.constant 0 : i32
    return %c0_i32, %c0_i32_0 : i32, i32
  }
  func.func @transform_17(%arg0: i32) -> (i32, i32, i32) {
    %c0_i32 = arith.constant 0 : i32
    %c0_i32_0 = arith.constant 0 : i32
    %c0_i32_1 = arith.constant 0 : i32
    %c0_i32_2 = arith.constant 0 : i32
    return %c0_i32, %c0_i32_0, %c0_i32_1 : i32, i32, i32
  }
  func.func @transform_18(%arg0: i32) -> (i32, i32, i32) {
    %c0_i32 = arith.constant 0 : i32
    %c0_i32_0 = arith.constant 0 : i32
    %c0_i32_1 = arith.constant 0 : i32
    %c0_i32_2 = arith.constant 0 : i32
    return %c0_i32, %c0_i32_0, %c0_i32_1 : i32, i32, i32
  }
  func.func @transform_19(%arg0: i32) -> (i32, i32, i32) {
    %c0_i32 = arith.constant 0 : i32
    %c0_i32_0 = arith.constant 0 : i32
    %c0_i32_1 = arith.constant 0 : i32
    %c0_i32_2 = arith.constant 0 : i32
    return %c0_i32, %c0_i32_0, %c0_i32_1 : i32, i32, i32
  }
  func.func @transform_20(%arg0: i32) -> (i32, i32, i32) {
    %c0_i32 = arith.constant 0 : i32
    %c0_i32_0 = arith.constant 0 : i32
    %c0_i32_1 = arith.constant 0 : i32
    %c0_i32_2 = arith.constant 0 : i32
    return %c0_i32, %c0_i32_0, %c0_i32_1 : i32, i32, i32
  }
  func.func @transform_21(%arg0: i32) -> (i32, i32, i32) {
    %c0_i32 = arith.constant 0 : i32
    %c0_i32_0 = arith.constant 0 : i32
    %c0_i32_1 = arith.constant 0 : i32
    return %arg0, %c0_i32, %c0_i32_0 : i32, i32, i32
  }
  func.func @transform_22(%arg0: i32) -> (i32, i32, i32) {
    %c0_i32 = arith.constant 0 : i32
    %c0_i32_0 = arith.constant 0 : i32
    %c0_i32_1 = arith.constant 0 : i32
    return %arg0, %c0_i32, %c0_i32_0 : i32, i32, i32
  }
}

</mosaic_0001>

<bundles_post_ra>
// kernel: hyper_rhn_sequence.1
= control target key start
LH: loop header
LB: loop body
LE: loop exit
PB: predicated region body
PF: predicated region fallthrough
CT: control target
= control target key end

     0   :  { %v2147_v0 = vmov 0.0   ;;  %vm75_vm0 = vcmask 130048   ;;  %vm2148_vm1 = vmmov 0   ;;  %vm78_vm2 = vcmask 261120   ;;  %s2697_s3 = inlined_call_operand.vmem [shape: f32[32,16], index: 3, kind: input, shape index: {}]   ;;  %s2698_s7 = inlined_call_operand.vmem [shape: f32[3,16,16], index: 7, kind: input, shape index: {}]   ;;  %s2699_s1 = inlined_call_operand.vmem [shape: f32[8,16], index: 1, kind: input, shape index: {}]   ;;  %s2700_s0 = inlined_call_operand.vmem [shape: f32[1,8,32], index: 0, kind: input, shape index: {}]   ;;  %s2701_s8 = inlined_call_operand.vmem [shape: f32[3,16,16], index: 8, kind: input, shape index: {}]   ;;  %s2702_s4 = inlined_call_operand.vmem [shape: f32[32,16], index: 4, kind: input, shape index: {}]   ;;  %s2703_s10 = inlined_call_operand.vmem [shape: f32[3,1,16], index: 10, kind: input, shape index: {}]   ;;  %s2704_s6 = inlined_call_operand.vmem [shape: f32[1,16], index: 6, kind: input, shape index: {}]   ;;  %s2705_s5 = inlined_call_operand.vmem [shape: f32[1,16], index: 5, kind: input, shape index: {}]   ;;  %s2706_s9 = inlined_call_operand.vmem [shape: f32[3,1,16], index: 9, kind: input, shape index: {}]   ;;  %s2707_s11 = inlined_call_operand.vmem [shape: f32[3,16,32], index: 11, kind: input, shape index: {}]   ;;  %s2708_s13 = inlined_call_operand.vmem [shape: f32[32,32], index: 13, kind: input, shape index: {}]   ;;  %s2709_s14 = inlined_call_operand.vmem [shape: f32[32,32], index: 14, kind: input, shape index: {}]   ;;  %s2710_s2 = inlined_call_operand.vmem [shape: f32[8,32], index: 2, kind: input, shape index: {}]   ;;  %s2711_s12 = inlined_call_operand.vmem [shape: f32[3,1,32], index: 12, kind: input, shape index: {}]   ;;  %s2712_s17 = inlined_call_operand.vmem [shape: f32[3,32,32], index: 17, kind: input, shape index: {}]   ;;  %s2713_s18 = inlined_call_operand.vmem [shape: f32[3,32,32], index: 18, kind: input, shape index: {}]   ;;  %s2714_s21 = inlined_call_operand.vmem [shape: f32[1,8,48], index: 21, kind: output, shape index: {0}]   ;;  %s2715_s15 = inlined_call_operand.vmem [shape: f32[1,32], index: 15, kind: input, shape index: {}]   ;;  %s2716_s20 = inlined_call_operand.vmem [shape: f32[3,1,32], index: 20, kind: input, shape index: {}]   ;;  %s2717_s16 = inlined_call_operand.vmem [shape: f32[1,32], index: 16, kind: input, shape index: {}]   ;;  %s2718_s19 = inlined_call_operand.vmem [shape: f32[3,1,32], index: 19, kind: input, shape index: {}]   ;;  %s2719_s22 = inlined_call_operand.vmem [shape: f32[1,8,96], index: 22, kind: output, shape index: {1}]  }
   0x1   :  { %2725 = sst [smem:[#allocation4_spill]] %s2697_s3  ;;  %1933 = vmatprep.subr.mxu0 %v2147_v0  ;;  %1944 = vmatprep.subr.mxu1 %v2147_v0  ;;  %v250_v21 = vlaneseq  ;;  %v1781_v30 = vld [vmem:[%s2704_s6] ss:$0 sm:$0xff]  ;;  %vm1756_vm3 = vcmask 392192   ;;  %vm1766_vm4 = vcmask 523264   ;;  %vm1768_vm5 = vcmask 785408  }
   0x2   :  { %2726 = sst [smem:[#allocation5_spill]] %s2698_s7  ;;  %1941 = vmatprep.mubr.msk.f32.mxu0 %vm2148_vm1, %v2147_v0  ;;  %1948 = vmatprep.mubr.msk.f32.mxu1 %vm2148_vm1, %v2147_v0  ;;  %v1778_v39 = vld [vmem:[%s2705_s5] ss:$0 sm:$0xff]  ;;  %s2149_s5 = smov 16  }
   0x3   :  { %2727 = sst [smem:[#allocation6_spill]] %s2699_s1  ;;  %v251_v27 = vshrl.u32 %v250_v21, 7  ;;  %v246_v40 = vld [vmem:[%s2706_s9] sm:$0x1]  ;;  %v1201_v21 = vld [vmem:[%s2709_s14 + $0x18] sm:$0xff] }
   0x4   :  { %2728 = sst [smem:[#allocation7_spill]] %s2700_s0  ;;  %v248_v42 = vmul.f32 0.0, %v246_v40 }
   0x5   :  { %2729 = sst [smem:[#allocation8_spill]] %s2701_s8  ;;  %v2370_v31 = vsub.s32 0, %v251_v27 }
   0x6   :  { %2730 = sst [smem:[#allocation9_spill]] %s2702_s4 }
   0x7   :  { %2731 = sst [smem:[#allocation10_spill]] %s2703_s10  ;;  %v253_v44 = vrot.slane %v248_v42, %v2370_v31 }
   0x8   :  { %s2732_s29 = sld [smem:[#allocation4_spill]] }
   0x9   :  { %s2733_s23 = sld [smem:[#allocation5_spill]] }
   0xa   :  { %s2734_s27 = sld [smem:[#allocation6_spill]] }
   0xb   :  { %s2735_s3 = sld [smem:[#allocation7_spill]] }
   0xc   :  { %s2736_s24 = sld [smem:[#allocation8_spill]] }
   0xd   :  { %s2737_s1 = sld [smem:[#allocation9_spill]] }
   0xe   :  { %v87_v1 = vld [vmem:[%s2732_s29 + $0x18] sm:$0xff]  ;;  %v86_v2 = vld [vmem:[%s2732_s29 + $0x10] sm:$0xff]  ;;  %v85_v5 = vld [vmem:[%s2732_s29 + $0x8] sm:$0xff]  ;;  %s2738_s30 = sld [smem:[#allocation10_spill]] }
   0xf   :  { %1934 = vmatpush3.msra.mxu0 %v87_v1  ;;  %v170_v3 = vld [vmem:[%s2733_s23 + $0x8] sm:$0xff]  ;;  %v169_v4 = vld [vmem:[%s2733_s23] sm:$0xff]  ;;  %v1786_v17 = vld [vmem:[%s2733_s23 + $0x18] sm:$0xff] }
  0x10   :  { %1935 = vmatprep.subr.mxu0 %v2147_v0  ;;  %1945 = vmatpush3.msra.mxu1 %v170_v3  ;;  %v74_v6 = vld [vmem:[%s2734_s27] sm:$0xff]  ;;  %v1785_v19 = vld [vmem:[%s2733_s23 + $0x10] sm:$0xff]  ;;  %v1797_v55 = vld [vmem:[%s2733_s23 + $0x28] sm:$0xff] }
  0x11   :  { %1936 = vmatpush3.msra.mxu0 %v86_v2  ;;  %1946 = vmatprep.subr.mxu1 %v2147_v0  ;;  %76 = vst.msk [vmem:[#allocation2] sm:$0xff] %vm75_vm0, %v74_v6  ;;  %v84_v7 = vld [vmem:[%s2732_s29] sm:$0xff] }
  0x12   :  { %1937 = vmatprep.subr.mxu0 %v2147_v0  ;;  %1947 = vmatpush3.msra.mxu1 %v169_v4  ;;  %v2299_v8 = vld [vmem:[%s2735_s3] sm:$0xff]  ;;  %v338_v9 = vld [vmem:[%s2736_s24 + $0x8] sm:$0xff]  ;;  %v1791_v16 = vld [vmem:[%s2736_s24 + $0x18] sm:$0xff] }
  0x13   :  { %1938 = vmatpush3.msra.mxu0 %v85_v5  ;;  %1951 = vmatprep.subr.mxu1 %v2147_v0  ;;  %v337_v10 = vld [vmem:[%s2736_s24] sm:$0xff]  ;;  %v259_v11 = vld [vmem:[%s2737_s1 + $0x18] sm:$0xff]  ;;  %v258_v13 = vld [vmem:[%s2737_s1 + $0x10] sm:$0xff] }
  0x14   :  { %1939 = vmatprep.subr.mxu0 %v2147_v0  ;;  %v257_v14 = vld [vmem:[%s2737_s1 + $0x8] sm:$0xff]  ;;  %v256_v15 = vld [vmem:[%s2737_s1] sm:$0xff]  ;;  %v1790_v18 = vld [vmem:[%s2736_s24 + $0x10] sm:$0xff] }
  0x15   :  { %1940 = vmatpush3.msra.mxu0 %v84_v7  ;;  %v410_v26 = vld [vmem:[%s2738_s30] sm:$0x1]  ;;  %v1802_v54 = vld [vmem:[%s2736_s24 + $0x28] sm:$0xff]  ;;  %v1793_v58 = vld [vmem:[%s2738_s30 + $0x1] ss:$0 sm:$0xff] }
  0x16   :  { %1942 = vmatmul.mubr.msk.f32.vlgmr.msra.gmra.mxu0 %vm78_vm2, %v2299_v8  ;;  %1962 = vmatprep.subr.mxu0 %v2147_v0  ;;  %v411_v29 = vmul.f32 0.0, %v410_v26  ;;  %v1801_v56 = vld [vmem:[%s2736_s24 + $0x20] sm:$0xff] }
  0x17   :  { %1963 = vmatpush3.msra.mxu0 %v338_v9  ;;  %1966 = vmatprep.mubr.msk.f32.mxu0 %vm2148_vm1, %v2147_v0  ;;  %v1796_v57 = vld [vmem:[%s2733_s23 + $0x20] sm:$0xff] }
  0x18   :  { %v2319_v12 = vld [vmem:[#allocation2] sm:$0xff]  ;;  %1964 = vmatprep.subr.mxu0 %v2147_v0  ;;  %v416_v34 = vrot.slane %v411_v29, %v2370_v31 }
  0x19   :  { %1949 = vmatmul.mubr.msk.f32.vlgmr.msra.gmra.mxu1 %vm75_vm0, %v2319_v12  ;;  %1965 = vmatpush3.msra.mxu0 %v337_v10  ;;  %v1788_v2 = vld [vmem:[%s2706_s9 + $0x1] ss:$0 sm:$0xff]  ;;  %v1804_v27 = vld [vmem:[%s2738_s30 + $0x2] ss:$0 sm:$0xff] }
  0x1a   :  { %1952 = vmatpush3.msra.mxu1 %v259_v11  ;;  %1959 = vmatprep.mubr.msk.f32.mxu1 %vm2148_vm1, %v2147_v0  ;;  %v1814_v26 = vld [vmem:[%s2707_s11 + $0x20] sm:$0xff] }
  0x1b   :  { %1953 = vmatprep.subr.mxu1 %v2147_v0  ;;  %1967 = vmatmul.mubr.msk.f32.vlgmr.msra.gmra.mxu0 %vm75_vm0, %v2319_v12 }
  0x1c   :  { %1954 = vmatpush3.msra.mxu1 %v258_v13  ;;  %1969 = vmatprep.subr.mxu0 %v2147_v0  ;;  %v783_v13 = vld [vmem:[%s2707_s11 + $0x8] sm:$0xff] }
  0x1d   :  { %1955 = vmatprep.subr.mxu1 %v2147_v0  ;;  %1973 = vmatprep.mubr.msk.f32.mxu0 %vm2148_vm1, %v2147_v0 }
  0x1e   :  { %1956 = vmatpush3.msra.mxu1 %v257_v14  ;;  %1970 = vmatpush3.msra.mxu0 %v1786_v17  ;;  %v1810_v14 = vld [vmem:[%s2707_s11 + $0x18] sm:$0xff] }
  0x1f   :  { %1957 = vmatprep.subr.mxu1 %v2147_v0  ;;  %1971 = vmatprep.subr.mxu0 %v2147_v0  ;;  %v1029_v17 = vld [vmem:[%s2708_s13 + $0x18] sm:$0xff] }
  0x20   :  { %1958 = vmatpush3.msra.mxu1 %v256_v15  ;;  %1972 = vmatpush3.msra.mxu0 %v1785_v19  ;;  %v782_v15 = vld [vmem:[%s2707_s11] sm:$0xff]  ;;  %v1027_v19 = vld [vmem:[%s2708_s13 + $0x8] sm:$0xff] }
  0x21   :  { %1960 = vmatmul.mubr.msk.f32.vlgmr.msra.gmra.mxu1 %vm78_vm2, %v2299_v8  ;;  %1976 = vmatprep.subr.mxu1 %v2147_v0 }
  0x22   :  { %1980 = vmatprep.mubr.msk.f32.mxu1 %vm2148_vm1, %v2147_v0  ;;  %1977 = vmatpush3.msra.mxu1 %v1791_v16  ;;  %v1809_v16 = vld [vmem:[%s2707_s11 + $0x10] sm:$0xff] }
  0x23   :  { %1978 = vmatprep.subr.mxu1 %v2147_v0  ;;  %1983 = vmatprep.subr.mxu0 %v2147_v0 }
  0x24   :  { %1979 = vmatpush3.msra.mxu1 %v1790_v18  ;;  %v1028_v18 = vld [vmem:[%s2708_s13 + $0x10] sm:$0xff] }
  0x25   :  { %1990 = vmatprep.subr.mxu1 %v2147_v0 }
  0xd6   :  { %v165_v20 = vpop.f32.mrf.mxu0 }
  0xd7   :  { %v166_v41 = vadd.f32 %v1778_v39, %v165_v20  ;;  %v1026_v20 = vld [vmem:[%s2708_s13] sm:$0xff] }
  0xd8   :  { %v1943_v22 = vpop.f32.mrf.mxu0  ;;  %v1807_v39 = vld [vmem:[%s2711_s12] ss:$0 sm:$0xff] }
  0xd9   :  { %v241_v23 = vpop.f32.mrf.mxu1  ;;  %v1200_v22 = vld [vmem:[%s2709_s14 + $0x10] sm:$0xff] }
  0xda   :  { %v245_v43 = vadd.f32 %v241_v23, %v166_v41  ;;  %v1199_v23 = vld [vmem:[%s2709_s14 + $0x8] sm:$0xff] }
  0xdb   :  { %v1950_v24 = vpop.f32.mrf.mxu1  ;;  %v405_v25 = vpop.f32.mrf.mxu0 }
  0xdc   :  { %v255_v46 = vadd.f32 %v253_v44, %v245_v43  ;;  %v1198_v24 = vld [vmem:[%s2709_s14] sm:$0xff] }
  0xdd   :  { %v1968_v28 = vpop.f32.mrf.mxu0  ;;  %v1799_v44 = vld [vmem:[%s2706_s9 + $0x2] ss:$0 sm:$0xff]  ;;  %s2150_s9 = smov 32  }
  0xe1   :  { %v333_v32 = vpop.f32.mrf.mxu1 }
  0xe2   :  { %v334_v33 = vadd.f32 %v1781_v30, %v333_v32 }
  0xe3   :  { %v1961_v35 = vpop.f32.mrf.mxu1 }
  0xe4   :  { %v409_v36 = vadd.f32 %v405_v25, %v334_v33  ;;  %v1815_v25 = vld [vmem:[%s2707_s11 + $0x28] sm:$0xff] }
  0xe6   :  { %v418_v37 = vadd.f32 %v416_v34, %v409_v36 }
  0xe8   :  { %v1784_v38 = vmul.f32 -1.442695, %v418_v37 }
  0xea   :  { %2111 = vpow2.f32 %v1784_v38 }
  0xf7   :  { %v2112_v45 = vpop.eup %2111 }
  0xf8   :  { %v422_v47 = vadd.f32 1.0, %v2112_v45 }
  0xfa   :  { %2113 = vrcp.f32 %v422_v47 }
  0xfb   :  { %2115 = vtanh.f32 %v255_v46 }
 0x107   :  { %v2114_v48 = vpop.eup %2113 }
 0x108   :  { %v427_v49 = vsub.f32 1.0, %v2114_v48  ;;  %v2116_v50 = vpop.eup %2115 }
 0x109   :  { %v426_v51 = vmul.f32 %v2116_v50, %v2114_v48 }
 0x10a   :  { %v428_v52 = vmul.f32 %v427_v49, %v2319_v12 }
 0x10c   :  { %v2381_v53 = vadd.f32 %v428_v52, %v426_v51 }
 0x10e   :  { %1974 = vmatmul.mubr.msk.f32.vlgmr.msra.gmra.mxu0 %vm75_vm0, %v2381_v53  ;;  %1981 = vmatmul.mubr.msk.f32.vlgmr.msra.gmra.mxu1 %vm75_vm0, %v2381_v53 }
 0x10f   :  { %1987 = vmatprep.mubr.msk.f32.mxu0 %vm2148_vm1, %v2147_v0  ;;  %1994 = vmatprep.mubr.msk.f32.mxu1 %vm2148_vm1, %v2147_v0 }
 0x110   :  { %1991 = vmatpush3.msra.mxu1 %v1802_v54  ;;  %1984 = vmatpush3.msra.mxu0 %v1797_v55 }
 0x111   :  { %1992 = vmatprep.subr.mxu1 %v2147_v0  ;;  %1985 = vmatprep.subr.mxu0 %v2147_v0 }
 0x112   :  { %1993 = vmatpush3.msra.mxu1 %v1801_v56  ;;  %1986 = vmatpush3.msra.mxu0 %v1796_v57 }
 0x113   :  { %2004 = vmatprep.subr.mxu1 %v2147_v0  ;;  %1997 = vmatprep.subr.mxu0 %v2147_v0 }
 0x1ce   :  { %v510_v59 = vpop.f32.mrf.mxu0  ;;  %v591_v60 = vpop.f32.mrf.mxu1 }
 0x1cf   :  { %v592_v61 = vadd.f32 %v1793_v58, %v591_v60  ;;  %v511_v4 = vadd.f32 %v1788_v2, %v510_v59  ;;  %v1112_v58 = vld [vmem:[%s2712_s17 + $0x18] sm:$0xff]  ;;  %v1111_v59 = vld [vmem:[%s2712_s17 + $0x10] sm:$0xff]  ;;  %v1110_v60 = vld [vmem:[%s2712_s17 + $0x8] sm:$0xff] }
 0x1d0   :  { %v1975_v62 = vpop.f32.mrf.mxu0  ;;  %v1982_v63 = vpop.f32.mrf.mxu1  ;;  %v1282_v2 = vld [vmem:[%s2713_s18 + $0x8] sm:$0xff] }
 0x1d1   :  { %v1795_v1 = vmul.f32 -1.442695, %v592_v61  ;;  %v1109_v61 = vld [vmem:[%s2712_s17] sm:$0xff]  ;;  %v1284_v63 = vld [vmem:[%s2713_s18 + $0x18] sm:$0xff] }
 0x1d3   :  { %2117 = vpow2.f32 %v1795_v1  ;;  %v1283_v1 = vld [vmem:[%s2713_s18 + $0x10] sm:$0xff] }
 0x1e0   :  { %v2118_v3 = vpop.eup %2117 }
 0x1e1   :  { %v598_v5 = vadd.f32 1.0, %v2118_v3  ;;  %v1281_v3 = vld [vmem:[%s2713_s18] sm:$0xff] }
 0x1e3   :  { %2119 = vrcp.f32 %v598_v5  ;;  %v1836_v5 = vld [vmem:[%s2713_s18 + $0x38] sm:$0xff] }
 0x1e4   :  { %2121 = vtanh.f32 %v511_v4  ;;  %v1829_v4 = vld [vmem:[%s2712_s17 + $0x38] sm:$0xff] }
 0x1f0   :  { %v2120_v6 = vpop.eup %2119 }
 0x1f1   :  { %v603_v7 = vsub.f32 1.0, %v2120_v6  ;;  %v2122_v9 = vpop.eup %2121 }
 0x1f2   :  { %v602_v10 = vmul.f32 %v2122_v9, %v2120_v6  ;;  %v1828_v6 = vld [vmem:[%s2712_s17 + $0x30] sm:$0xff]  ;;  %v1827_v9 = vld [vmem:[%s2712_s17 + $0x28] sm:$0xff] }
 0x1f3   :  { %v604_v11 = vmul.f32 %v603_v7, %v2381_v53  ;;  %v1835_v7 = vld [vmem:[%s2713_s18 + $0x30] sm:$0xff] }
 0x1f5   :  { %v2414_v12 = vadd.f32 %v604_v11, %v602_v10  ;;  %v1834_v10 = vld [vmem:[%s2713_s18 + $0x28] sm:$0xff] }
 0x1f7   :  { %1748 = vrot.lane.b32.xlu0 %v2414_v12, %s2149_s5  ;;  %1988 = vmatmul.mubr.msk.f32.vlgmr.msra.gmra.mxu0 %vm75_vm0, %v2414_v12 }
 0x1f8   :  { %1995 = vmatmul.mubr.msk.f32.vlgmr.msra.gmra.mxu1 %vm75_vm0, %v2414_v12  ;;  %1998 = vmatpush3.msra.mxu0 %v783_v13  ;;  %v1833_v13 = vld [vmem:[%s2713_s18 + $0x20] sm:$0xff] }
 0x1f9   :  { %2005 = vmatpush3.msra.mxu1 %v1810_v14  ;;  %1999 = vmatprep.subr.mxu0 %v2147_v0 }
 0x1fa   :  { %2006 = vmatprep.subr.mxu1 %v2147_v0  ;;  %2000 = vmatpush3.msra.mxu0 %v782_v15 }
 0x1fb   :  { %2007 = vmatpush3.msra.mxu1 %v1809_v16  ;;  %2001 = vmatprep.mubr.msk.f32.mxu0 %vm2148_vm1, %v2147_v0 }
 0x1fc   :  { %2008 = vmatprep.mubr.msk.f32.mxu1 %vm2148_vm1, %v2147_v0  ;;  %2018 = vmatprep.subr.mxu1 %v2147_v0 }
 0x1fd   :  { %2002 = vmatmul.mubr.msk.f32.vlgmr.msra.gmra.mxu0 %vm75_vm0, %v2381_v53  ;;  %2009 = vmatmul.mubr.msk.f32.vlgmr.msra.gmra.mxu1 %vm75_vm0, %v2414_v12 }
 0x1fe   :  { %2019 = vmatpush3.msra.mxu1 %v1029_v17  ;;  %2026 = vmatprep.mubr.msk.f32.mxu1 %vm2148_vm1, %v2147_v0 }
 0x1ff   :  { %2020 = vmatprep.subr.mxu1 %v2147_v0  ;;  %2011 = vmatprep.subr.mxu0 %v2147_v0 }
 0x200   :  { %2021 = vmatpush3.msra.mxu1 %v1028_v18  ;;  %2015 = vmatprep.mubr.msk.f32.mxu0 %vm2148_vm1, %v2147_v0 }
 0x201   :  { %2022 = vmatprep.subr.mxu1 %v2147_v0  ;;  %2012 = vmatpush3.msra.mxu0 %v1815_v25 }
 0x202   :  { %2023 = vmatpush3.msra.mxu1 %v1027_v19  ;;  %2013 = vmatprep.subr.mxu0 %v2147_v0 }
 0x203   :  { %2024 = vmatprep.subr.mxu1 %v2147_v0  ;;  %2014 = vmatpush3.msra.mxu0 %v1814_v26 }
 0x204   :  { %2025 = vmatpush3.msra.mxu1 %v1026_v20  ;;  %2029 = vmatprep.subr.mxu0 %v2147_v0 }
 0x205   :  { %2027 = vmatmul.mubr.msk.f32.vlgmr.msra.gmra.mxu1 %vm78_vm2, %v2299_v8  ;;  %2040 = vmatprep.subr.mxu1 %v2147_v0 }
 0x206   :  { %2041 = vmatpush3.msra.mxu1 %v1201_v21  ;;  %2048 = vmatprep.mubr.msk.f32.mxu1 %vm2148_vm1, %v2147_v0 }
 0x207   :  { %2042 = vmatprep.subr.mxu1 %v2147_v0 }
 0x208   :  { %2043 = vmatpush3.msra.mxu1 %v1200_v22 }
 0x209   :  { %2044 = vmatprep.subr.mxu1 %v2147_v0 }
 0x20a   :  { %2045 = vmatpush3.msra.mxu1 %v1199_v23 }
 0x20b   :  { %2046 = vmatprep.subr.mxu1 %v2147_v0 }
 0x20c   :  { %2047 = vmatpush3.msra.mxu1 %v1198_v24  ;;  %v1358_v24 = vld [vmem:[%s2716_s20] sm:$0x1] }
 0x20d   :  { %2049 = vmatmul.mubr.msk.f32.vlgmr.msra.gmra.mxu1 %vm78_vm2, %v2299_v8  ;;  %2062 = vmatprep.subr.mxu1 %v2147_v0  ;;  %v77_v8 = vld [vmem:[%s2710_s2] sm:$0xff]  ;;  %v1359_v26 = vmul.f32 0.0, %v1358_v24 }
 0x20e   :  { %2070 = vmatprep.mubr.msk.f32.mxu1 %vm2148_vm1, %v2147_v0  ;;  %79 = vst.msk [vmem:[#allocation3] sm:$0xff] %vm78_vm2, %v77_v8  ;;  %2063 = vmatpush3.msra.mxu1 %v1829_v4  ;;  %v1823_v8 = vld [vmem:[%s2717_s16] ss:$0 sm:$0xff] }
 0x20f   :  { %2064 = vmatprep.subr.mxu1 %v2147_v0 }
 0x210   :  { %2065 = vmatpush3.msra.mxu1 %v1828_v6 }
 0x211   :  { %2066 = vmatprep.subr.mxu1 %v2147_v0 }
 0x212   :  { %2067 = vmatpush3.msra.mxu1 %v1827_v9 }
 0x213   :  { %2068 = vmatprep.subr.mxu1 %v2147_v0 }
 0x215   :  { %v2540_v62 = vld [vmem:[#allocation3] sm:$0xff] }
 0x269   :  { %v1749_v11 = vpop.permute.xlu0 %1748 }
 0x26a   :  { %v1754_v14 = vsel %vm75_vm0, %v2381_v53, %v1749_v11  ;;  %v1820_v53 = vld [vmem:[%s2715_s15] ss:$0 sm:$0xff] }
 0x2b7   :  { %v686_v28 = vpop.f32.mrf.mxu0 }
 0x2b8   :  { %v767_v29 = vpop.f32.mrf.mxu1  ;;  %v687_v46 = vadd.f32 %v1799_v44, %v686_v28 }
 0x2b9   :  { %v768_v30 = vadd.f32 %v1804_v27, %v767_v29  ;;  %v1989_v32 = vpop.f32.mrf.mxu0 }
 0x2ba   :  { %v1996_v33 = vpop.f32.mrf.mxu1 }
 0x2bb   :  { %v1806_v34 = vmul.f32 -1.442695, %v768_v30  ;;  %v1364_v33 = vrot.slane %v1359_v26, %v2370_v31  ;;  %v1847_v26 = vld [vmem:[%s2718_s19 + $0x2] ss:$0 sm:$0xff] }
 0x2bd   :  { %2123 = vpow2.f32 %v1806_v34  ;;  %v857_v35 = vpop.f32.mrf.mxu0  ;;  %v2504_v36 = vpop.f32.mrf.mxu1 }
 0x2be   :  { %v2509_v40 = vadd.f32 %v1807_v39, %v857_v35 }
 0x2bf   :  { %v2003_v37 = vpop.f32.mrf.mxu0  ;;  %v2010_v38 = vpop.f32.mrf.mxu1 }
 0x2c0   :  { %v1189_v38 = vld [vmem:[%s2718_s19] sm:$0x1] }
 0x2c1   :  { %v1190_v39 = vmul.f32 0.0, %v1189_v38 }
 0x2c5   :  { %v1096_v41 = vpop.f32.mrf.mxu1 }
 0x2c6   :  { %v2512_v42 = vmul.f32 %v1096_v41, %v2509_v40  ;;  %v1195_v41 = vrot.slane %v1190_v39, %v2370_v31  ;;  %v1844_v31 = vld [vmem:[%s2712_s17 + $0x58] sm:$0xff] }
 0x2c7   :  { %v2028_v43 = vpop.f32.mrf.mxu1 }
 0x2c8   :  { %v1108_v22 = vadd.f32 %v1820_v53, %v2512_v42 }
 0x2ca   :  { %v2124_v45 = vpop.eup %2123 }
 0x2cb   :  { %v774_v47 = vadd.f32 1.0, %v2124_v45 }
 0x2cd   :  { %2125 = vrcp.f32 %v774_v47  ;;  %v1268_v48 = vpop.f32.mrf.mxu1 }
 0x2ce   :  { %v2518_v49 = vmul.f32 %v1268_v48, %v2509_v40  ;;  %2127 = vtanh.f32 %v687_v46 }
 0x2cf   :  { %v2050_v50 = vpop.f32.mrf.mxu1 }
 0x2d0   :  { %v1280_v30 = vadd.f32 %v1823_v8, %v2518_v49  ;;  %v1851_v50 = vld [vmem:[%s2713_s18 + $0x58] sm:$0xff] }
 0x2da   :  { %v2126_v51 = vpop.eup %2125 }
 0x2db   :  { %v779_v52 = vsub.f32 1.0, %v2126_v51  ;;  %v2128_v54 = vpop.eup %2127 }
 0x2dc   :  { %v778_v55 = vmul.f32 %v2128_v54, %v2126_v51  ;;  %v1843_v51 = vld [vmem:[%s2712_s17 + $0x50] sm:$0xff]  ;;  %v1842_v54 = vld [vmem:[%s2712_s17 + $0x48] sm:$0xff] }
 0x2dd   :  { %v780_v56 = vmul.f32 %v779_v52, %v2414_v12  ;;  %v1826_v12 = vld [vmem:[%s2712_s17 + $0x20] sm:$0xff]  ;;  %v1850_v52 = vld [vmem:[%s2713_s18 + $0x50] sm:$0xff] }
 0x2de   :  { %2069 = vmatpush3.msra.mxu1 %v1826_v12 }
 0x2df   :  { %v781_v57 = vadd.f32 %v780_v56, %v778_v55  ;;  %2084 = vmatprep.subr.mxu1 %v2147_v0  ;;  %v1849_v55 = vld [vmem:[%s2713_s18 + $0x48] sm:$0xff]  ;;  %v1841_v56 = vld [vmem:[%s2712_s17 + $0x40] sm:$0xff] }
 0x2e1   :  { %1751 = vrot.lane.b32.xlu1 %v781_v57, %s2150_s9  ;;  %1746 = vst.msk [vmem:[#allocation2] sm:$0xff] %vm75_vm0, %v781_v57  ;;  %2016 = vmatmul.mubr.msk.f32.vlgmr.msra.gmra.mxu0 %vm75_vm0, %v781_v57  ;;  %v1848_v57 = vld [vmem:[%s2713_s18 + $0x40] sm:$0xff] }
 0x2e2   :  { %2030 = vmatpush3.msra.mxu0 %v1112_v58  ;;  %2037 = vmatprep.mubr.msk.f32.mxu0 %vm2148_vm1, %v2147_v0  ;;  %v1812_v58 = vld [vmem:[%s2711_s12 + $0x1] ss:$0 sm:$0xff] }
 0x2e3   :  { %2031 = vmatprep.subr.mxu0 %v2147_v0 }
 0x2e4   :  { %2032 = vmatpush3.msra.mxu0 %v1111_v59  ;;  %v939_v59 = vadd.f32 %v1812_v58, %v2504_v36 }
 0x2e5   :  { %2033 = vmatprep.subr.mxu0 %v2147_v0 }
 0x2e6   :  { %2034 = vmatpush3.msra.mxu0 %v1110_v60 }
 0x2e7   :  { %2035 = vmatprep.subr.mxu0 %v2147_v0 }
 0x2e8   :  { %2036 = vmatpush3.msra.mxu0 %v1109_v61 }
 0x2e9   :  { %2038 = vmatmul.mubr.msk.f32.vlgmr.msra.gmra.mxu0 %vm78_vm2, %v2540_v62  ;;  %2051 = vmatprep.subr.mxu0 %v2147_v0 }
 0x2ea   :  { %2052 = vmatpush3.msra.mxu0 %v1284_v63  ;;  %2059 = vmatprep.mubr.msk.f32.mxu0 %vm2148_vm1, %v2147_v0 }
 0x2eb   :  { %2053 = vmatprep.subr.mxu0 %v2147_v0 }
 0x2ec   :  { %2054 = vmatpush3.msra.mxu0 %v1283_v1 }
 0x2ed   :  { %2055 = vmatprep.subr.mxu0 %v2147_v0 }
 0x2ee   :  { %2056 = vmatpush3.msra.mxu0 %v1282_v2 }
 0x2ef   :  { %2057 = vmatprep.subr.mxu0 %v2147_v0 }
 0x2f0   :  { %2058 = vmatpush3.msra.mxu0 %v1281_v3 }
 0x2f1   :  { %2060 = vmatmul.mubr.msk.f32.vlgmr.msra.gmra.mxu0 %vm78_vm2, %v2540_v62  ;;  %2073 = vmatprep.subr.mxu0 %v2147_v0 }
 0x2f2   :  { %2081 = vmatprep.mubr.msk.f32.mxu0 %vm2148_vm1, %v2147_v0  ;;  %2074 = vmatpush3.msra.mxu0 %v1836_v5  ;;  %v1832_v5 = vld [vmem:[%s2718_s19 + $0x1] ss:$0 sm:$0xff] }
 0x2f3   :  { %2075 = vmatprep.subr.mxu0 %v2147_v0 }
 0x2f4   :  { %2076 = vmatpush3.msra.mxu0 %v1835_v7 }
 0x2f5   :  { %2077 = vmatprep.subr.mxu0 %v2147_v0 }
 0x2f6   :  { %2078 = vmatpush3.msra.mxu0 %v1834_v10 }
 0x2f7   :  { %2079 = vmatprep.subr.mxu0 %v2147_v0 }
 0x2f8   :  { %2080 = vmatpush3.msra.mxu0 %v1833_v13 }
 0x2f9   :  { %2095 = vmatprep.subr.mxu0 %v2147_v0 }
 0x353   :  { %v1752_v15 = vpop.permute.xlu1 %1751 }
 0x354   :  { %v1755_v16 = vsel %vm78_vm2, %v1754_v14, %v1752_v15  ;;  %v1817_v15 = vld [vmem:[%s2711_s12 + $0x2] ss:$0 sm:$0xff]  ;;  %s2151_s12 = smov 64  }
 0x355   :  { %1757 = vst.msk [vmem:[%s2714_s21] sm:$0xff] %vm1756_vm3, %v1755_v16 }
 0x3a1   :  { %v2606_v17 = vpop.f32.mrf.mxu0 }
 0x3a2   :  { %v1023_v16 = vadd.f32 %v1817_v15, %v2606_v17 }
 0x3a3   :  { %v2017_v18 = vpop.f32.mrf.mxu0 }
 0x3a9   :  { %v1182_v19 = vpop.f32.mrf.mxu0 }
 0x3aa   :  { %v1186_v20 = vmul.f32 %v1182_v19, %v2509_v40  ;;  %v1854_v19 = vld [vmem:[%s2716_s20 + $0x2] ss:$0 sm:$0xff] }
 0x3ab   :  { %v2039_v21 = vpop.f32.mrf.mxu0 }
 0x3ac   :  { %v1187_v23 = vmul.f32 0.0, %v1186_v20 }
 0x3ae   :  { %v1188_v25 = vadd.f32 %v1187_v23, %v1108_v22 }
 0x3b0   :  { %v1197_v42 = vadd.f32 %v1195_v41, %v1188_v25 }
 0x3b1   :  { %v1351_v27 = vpop.f32.mrf.mxu0 }
 0x3b2   :  { %v1355_v28 = vmul.f32 %v1351_v27, %v2509_v40 }
 0x3b3   :  { %v2061_v29 = vpop.f32.mrf.mxu0 }
 0x3b4   :  { %v1356_v32 = vmul.f32 0.0, %v1355_v28 }
 0x3b6   :  { %v1357_v34 = vadd.f32 %v1356_v32, %v1280_v30 }
 0x3b8   :  { %v1366_v35 = vadd.f32 %v1364_v33, %v1357_v34 }
 0x3ba   :  { %v1825_v37 = vmul.f32 -1.442695, %v1366_v35 }
 0x3bc   :  { %2129 = vpow2.f32 %v1825_v37 }
 0x3bd   :  { %2131 = vtanh.f32 %v1197_v42 }
 0x3c9   :  { %v2130_v43 = vpop.eup %2129 }
 0x3ca   :  { %v1370_v40 = vadd.f32 1.0, %v2130_v43  ;;  %v2132_v44 = vpop.eup %2131 }
 0x3cc   :  { %2133 = vrcp.f32 %v1370_v40 }
 0x3d9   :  { %v2134_v45 = vpop.eup %2133 }
 0x3da   :  { %v1374_v46 = vmul.f32 %v2134_v45, %v2132_v44  ;;  %v1375_v47 = vsub.f32 1.0, %v2134_v45 }
 0x3dc   :  { %v1376_v48 = vmul.f32 %v1375_v47, %v2540_v62  ;;  %v1839_v62 = vld [vmem:[%s2716_s20 + $0x1] ss:$0 sm:$0xff] }
 0x3de   :  { %v2627_v49 = vadd.f32 %v1376_v48, %v1374_v46 }
 0x3e0   :  { %2071 = vmatmul.mubr.msk.f32.vlgmr.msra.gmra.mxu1 %vm78_vm2, %v2627_v49  ;;  %2082 = vmatmul.mubr.msk.f32.vlgmr.msra.gmra.mxu0 %vm78_vm2, %v2627_v49 }
 0x3e1   :  { %2092 = vmatprep.mubr.msk.f32.mxu1 %vm2148_vm1, %v2147_v0  ;;  %2103 = vmatprep.mubr.msk.f32.mxu0 %vm2148_vm1, %v2147_v0 }
 0x3e2   :  { %2085 = vmatpush3.msra.mxu1 %v1844_v31  ;;  %2096 = vmatpush3.msra.mxu0 %v1851_v50 }
 0x3e3   :  { %2086 = vmatprep.subr.mxu1 %v2147_v0  ;;  %2097 = vmatprep.subr.mxu0 %v2147_v0 }
 0x3e4   :  { %2087 = vmatpush3.msra.mxu1 %v1843_v51  ;;  %2098 = vmatpush3.msra.mxu0 %v1850_v52 }
 0x3e5   :  { %2088 = vmatprep.subr.mxu1 %v2147_v0  ;;  %2099 = vmatprep.subr.mxu0 %v2147_v0 }
 0x3e6   :  { %2089 = vmatpush3.msra.mxu1 %v1842_v54  ;;  %2100 = vmatpush3.msra.mxu0 %v1849_v55 }
 0x3e7   :  { %2090 = vmatprep.subr.mxu1 %v2147_v0  ;;  %2101 = vmatprep.subr.mxu0 %v2147_v0 }
 0x3e8   :  { %2091 = vmatpush3.msra.mxu1 %v1841_v56  ;;  %2102 = vmatpush3.msra.mxu0 %v1848_v57 }
 0x4a0   :  { %v1452_v60 = vpop.f32.mrf.mxu1  ;;  %v1537_v61 = vpop.f32.mrf.mxu0 }
 0x4a1   :  { %v1541_v63 = vmul.f32 %v1537_v61, %v939_v59  ;;  %v1456_v0 = vmul.f32 %v1452_v60, %v939_v59 }
 0x4a2   :  { %v2072_v1 = vpop.f32.mrf.mxu1  ;;  %v2083_v2 = vpop.f32.mrf.mxu0 }
 0x4a3   :  { %v1550_v3 = vadd.f32 %v1839_v62, %v1541_v63  ;;  %v1465_v7 = vadd.f32 %v1832_v5, %v1456_v0 }
 0x4a5   :  { %v1840_v4 = vmul.f32 -1.442695, %v1550_v3 }
 0x4a7   :  { %2135 = vpow2.f32 %v1840_v4 }
 0x4b4   :  { %v2136_v6 = vpop.eup %2135 }
 0x4b5   :  { %v1554_v36 = vadd.f32 1.0, %v2136_v6 }
 0x4b7   :  { %2137 = vrcp.f32 %v1554_v36 }
 0x4b8   :  { %2139 = vtanh.f32 %v1465_v7 }
 0x4c4   :  { %v2138_v9 = vpop.eup %2137 }
 0x4c5   :  { %v1559_v10 = vsub.f32 1.0, %v2138_v9  ;;  %v2140_v11 = vpop.eup %2139 }
 0x4c6   :  { %v1558_v12 = vmul.f32 %v2140_v11, %v2138_v9 }
 0x4c7   :  { %v1560_v13 = vmul.f32 %v1559_v10, %v2627_v49 }
 0x4c9   :  { %v1561_v14 = vadd.f32 %v1560_v13, %v1558_v12 }
 0x4cb   :  { %1758 = vrot.lane.b32.xlu0 %v1561_v14, %s2150_s9  ;;  %2093 = vmatmul.mubr.msk.f32.vlgmr.msra.gmra.mxu1 %vm78_vm2, %v1561_v14 }
 0x4cc   :  { %2104 = vmatmul.mubr.msk.f32.vlgmr.msra.gmra.mxu0 %vm78_vm2, %v1561_v14 }
 0x53d   :  { %v1759_v35 = vpop.permute.xlu0 %1758 }
 0x53e   :  { %v1765_v37 = vsel %vm78_vm2, %v2627_v49, %v1759_v35 }
 0x58b   :  { %v1636_v18 = vpop.f32.mrf.mxu1 }
 0x58c   :  { %v1721_v53 = vpop.f32.mrf.mxu0  ;;  %v1640_v25 = vmul.f32 %v1636_v18, %v1023_v16 }
 0x58d   :  { %v1725_v20 = vmul.f32 %v1721_v53, %v1023_v16  ;;  %v2094_v21 = vpop.f32.mrf.mxu1 }
 0x58e   :  { %v2105_v22 = vpop.f32.mrf.mxu0  ;;  %v1649_v27 = vadd.f32 %v1847_v26, %v1640_v25 }
 0x58f   :  { %v1734_v23 = vadd.f32 %v1854_v19, %v1725_v20 }
 0x591   :  { %v1855_v24 = vmul.f32 -1.442695, %v1734_v23 }
 0x593   :  { %2141 = vpow2.f32 %v1855_v24 }
 0x5a0   :  { %v2142_v8 = vpop.eup %2141 }
 0x5a1   :  { %v1738_v17 = vadd.f32 1.0, %v2142_v8 }
 0x5a3   :  { %2143 = vrcp.f32 %v1738_v17 }
 0x5a4   :  { %2145 = vtanh.f32 %v1649_v27 }
 0x5b0   :  { %v2144_v28 = vpop.eup %2143 }
 0x5b1   :  { %v1743_v29 = vsub.f32 1.0, %v2144_v28  ;;  %v2146_v30 = vpop.eup %2145 }
 0x5b2   :  { %v1742_v32 = vmul.f32 %v2146_v30, %v2144_v28 }
 0x5b3   :  { %v1744_v33 = vmul.f32 %v1743_v29, %v1561_v14 }
 0x5b5   :  { %v1745_v34 = vadd.f32 %v1744_v33, %v1742_v32 }
 0x5b7   :  { %1762 = vrot.lane.b32.xlu1 %v1745_v34, %s2151_s12  ;;  %1747 = vst.msk [vmem:[#allocation3] sm:$0xff] %vm78_vm2, %v1745_v34 }
 0x629   :  { %v1763_v38 = vpop.permute.xlu1 %1762 }
 0x62a   :  { %v1767_v39 = vsel %vm1766_vm4, %v1765_v37, %v1763_v38 }
 0x62b   :  { %1769 = vst.msk [vmem:[%s2719_s22] sm:$0xff] %vm1768_vm5, %v1767_v39 }

</bundles_post_ra>
